<compile_context>
chip_gen: v6e
topology: v6e:2x2x1
jax: 0.10.0
libtpu: 0.0.40
codegen_flags: <defaults>
</compile_context>

<pallas_src>
import functools

import jax
import jax.numpy as jnp
from jax import lax
from jax.experimental import pallas as pl
from jax.experimental.pallas import tpu as pltpu

C_OUT = 512          # Conv2d output channels in both boundary branches (SIMI_DIM)
LSTM_HIDDEN = 512    # BiLSTM hidden size (module constant)
FC_HIDDEN = 100      # fc1 output size (module constant)
CHAN_UNROLL = 8      # channel-loop unroll factor in the relation part
assert C_OUT % CHAN_UNROLL == 0


def _round_up(x, m):
    return ((x + m - 1) // m) * m


def _pick_relation_compute_dtype():
    """bf16 VALU exists on v6e/v7x; v5e and older have no bf16 VPU -> keep f32."""
    try:
        kind = jax.devices()[0].device_kind.lower()
    except Exception:
        return jnp.float32
    if "v6" in kind or "v7" in kind:
        return jnp.bfloat16
    return jnp.float32


_RELATION_COMPUTE_DTYPE = _pick_relation_compute_dtype()


# ---------------------------------------------------------------------------
# Fused BoundaryRelation + BoundaryDifference kernel (modality-batched)
# ---------------------------------------------------------------------------
def _boundary_fused_kernel(w0_ref, w1_ref, b_ref,          # SMEM, flat (M*C_OUT,)
                           w2_ref, wb2_ref, b2d_ref,       # VMEM (1, 1, C_OUT) blocks
                           x_ref,                          # VMEM (1, 2, blk_n, d_pad)
                           o_ref,                          # VMEM (1, blk_n, d_pad+C_OUT)
                           *, d_pad, compute_dtype):
    m = pl.program_id(0)
    base = m * C_OUT

    x0f = x_ref[0, 0]                                      # (blk_n, d_pad) f32
    x1f = x_ref[0, 1]

    # ---- BoundaryRelation: out[:, :d_pad] = max_c (w0[c]*x0 + w1[c]*x1 + b[c]) ----
    x0 = x0f.astype(compute_dtype)
    x1 = x1f.astype(compute_dtype)

    def chan_val(c):
        idx = base + c
        return (w0_ref[idx].astype(compute_dtype) * x0
                + w1_ref[idx].astype(compute_dtype) * x1
                + b_ref[idx].astype(compute_dtype))

    # Peel the first unrolled chunk: channel 0 initializes the running max directly.
    acc = chan_val(0)
    for u in range(1, CHAN_UNROLL):
        acc = jnp.maximum(acc, chan_val(u))

    def body(j, acc):
        c0 = j * CHAN_UNROLL
        for u in range(CHAN_UNROLL):       # static 8-way unroll inside the loop body
            acc = jnp.maximum(acc, chan_val(c0 + u))
        return acc

    acc = lax.fori_loop(1, C_OUT // CHAN_UNROLL, body, acc)
    o_ref[0, :, 0:d_pad] = acc.astype(o_ref.dtype)

    # ---- BoundaryDifference: out[:, d_pad:] = per-channel cosine similarity ----
    # cos over D of a_c = w[c]*x0 + b[c] and c_c = w[c]*x1 + b[c], expanded so only
    # 5 per-row reductions over D are needed; channel math is lane-dense (blk, 512).
    blk_n = x0f.shape[0]
    s00 = jnp.sum(x0f * x0f, axis=-1, keepdims=True)       # (blk_n, 1)
    s11 = jnp.sum(x1f * x1f, axis=-1, keepdims=True)
    s01 = jnp.sum(x0f * x1f, axis=-1, keepdims=True)
    s0 = jnp.sum(x0f, axis=-1, keepdims=True)
    s1 = jnp.sum(x1f, axis=-1, keepdims=True)
    s01h = (s0 + s1) * 0.5                                  # narrow (blk_n, 1) math

    # Hoist every broadcast once and reuse (JAX does not CSE broadcast_in_dim).
    shape = (blk_n, C_OUT)
    w2 = jnp.broadcast_to(w2_ref[0], shape)                 # w^2
    wb2 = jnp.broadcast_to(wb2_ref[0], shape)               # 2*w*b (precomputed host-side)
    b2d = jnp.broadcast_to(b2d_ref[0], shape)               # b^2 * D_true
    b01 = jnp.broadcast_to(s01, shape)
    b0h = jnp.broadcast_to(s01h, shape)
    b00 = jnp.broadcast_to(s00, shape)
    b11 = jnp.broadcast_to(s11, shape)
    b0 = jnp.broadcast_to(s0, shape)
    b1 = jnp.broadcast_to(s1, shape)

    num = w2 * b01 + wb2 * b0h + b2d
    # torch F.cosine_similarity clamps EACH norm at eps=1e-8 -> clamp quadratics at eps^2.
    na2 = jnp.maximum(w2 * b00 + wb2 * b0 + b2d, 1e-16)
    nb2 = jnp.maximum(w2 * b11 + wb2 * b1 + b2d, 1e-16)
    cos = num * lax.rsqrt(na2 * nb2)                        # one EUP op, no sqrt/sqrt/div
    o_ref[0, :, d_pad:] = cos.astype(o_ref.dtype)


def boundary_fused(x_all, rel_w0, rel_w1, rel_b, w2, wb2, b2d, *, block_rows,
                   compute_dtype=jnp.float32):
    """Fused BoundaryNet conv branches, batched over modality.

    x_all : (M, 2, n_pad, d_pad) f32 (zero-padded).
    Returns (M, n_pad, d_pad + C_OUT): relation in cols [0:d_pad], cosine in [d_pad:].
    """
    M, two, n_pad, d_pad = x_all.shape
    assert two == 2 and n_pad % block_rows == 0 and d_pad % 128 == 0
    w_out = d_pad + C_OUT

    kernel = functools.partial(_boundary_fused_kernel, d_pad=d_pad,
                               compute_dtype=compute_dtype)

    return pl.pallas_call(
        kernel,
        out_shape=jax.ShapeDtypeStruct((M, n_pad, w_out), jnp.float32),
        grid_spec=pltpu.PrefetchScalarGridSpec(
            num_scalar_prefetch=0,
            grid=(M, n_pad // block_rows),
            in_specs=[
                pl.BlockSpec(memory_space=pltpu.MemorySpace.SMEM),   # rel w0 (flat)
                pl.BlockSpec(memory_space=pltpu.MemorySpace.SMEM),   # rel w1 (flat)
                pl.BlockSpec(memory_space=pltpu.MemorySpace.SMEM),   # rel b  (flat)
                pl.BlockSpec((1, 1, C_OUT), lambda m, i: (m, 0, 0)), # w^2
                pl.BlockSpec((1, 1, C_OUT), lambda m, i: (m, 0, 0)), # 2*w*b
                pl.BlockSpec((1, 1, C_OUT), lambda m, i: (m, 0, 0)), # b^2*D
                pl.BlockSpec((1, 2, block_rows, d_pad), lambda m, i: (m, 0, i, 0)),
            ],
            out_specs=pl.BlockSpec((1, block_rows, w_out), lambda m, i: (m, i, 0)),
        ),
        compiler_params=pltpu.CompilerParams(
            dimension_semantics=("parallel", "parallel"),
        ),
        cost_estimate=pl.CostEstimate(
            flops=int(M * n_pad * (5 * d_pad * C_OUT + 10 * d_pad + 16 * C_OUT)),
            transcendentals=int(M * n_pad * C_OUT),
            bytes_accessed=int(4 * (2 * M * n_pad * d_pad + M * n_pad * w_out
                                    + 6 * M * C_OUT)),
        ),
    )(rel_w0, rel_w1, rel_b, w2, wb2, b2d, x_all)


# ---------------------------------------------------------------------------
# Wrapper-side packing for the fused kernel
# ---------------------------------------------------------------------------
def _stack_boundary_inputs(xs, max_block_rows=128):
    """xs: list of (bs, T, 2, D_m) -> (M, 2, n_pad, d_pad) stacked, zero-padded."""
    bs, seq = xs[0].shape[0], xs[0].shape[1]
    N = bs * seq
    d_list = [int(x.shape[-1]) for x in xs]
    d_pad = _round_up(max(d_list), 128)
    block_rows = min(max_block_rows, _round_up(N, 8))
    n_pad = _round_up(N, block_rows)
    stacked = []
    for x, d in zip(xs, d_list):
        x2 = jnp.transpose(x.reshape(N, 2, d), (1, 0, 2)).astype(jnp.float32)
        x2 = jnp.pad(x2, ((0, 0), (0, n_pad - N), (0, d_pad - d)))
        stacked.append(x2)
    return jnp.stack(stacked), N, d_pad, d_list, block_rows


def _stack_boundary_params(params_list, d_list):
    rel_w0 = jnp.concatenate([p["rel_w0"].astype(jnp.float32) for p in params_list])
    rel_w1 = jnp.concatenate([p["rel_w1"].astype(jnp.float32) for p in params_list])
    rel_b = jnp.concatenate([p["rel_b"].astype(jnp.float32) for p in params_list])
    w = jnp.stack([p["diff_w"].astype(jnp.float32) for p in params_list])    # (M, C)
    b = jnp.stack([p["diff_b"].astype(jnp.float32) for p in params_list])
    d_true = jnp.asarray(d_list, jnp.float32)[:, None]                       # TRUE D per modality
    w2 = (w * w)[:, None, :]
    wb2 = (2.0 * w * b)[:, None, :]
    b2d = (b * b * d_true)[:, None, :]
    return rel_w0, rel_w1, rel_b, w2, wb2, b2d


# ---------------------------------------------------------------------------
# Batched BiLSTM + heads (plain JAX) and full LGSceneSeg forward
# ---------------------------------------------------------------------------
# TODO(synk): the BiLSTM recurrence stays in plain JAX (lax.scan) -- a time-sequential
# LSTM has no clean single Pallas-kernel equivalent; it is now batched over
# (4 modalities x 2 directions) with the input projection hoisted out of the scan.
def batched_bilstm(x_pad, params_list, d_list, d_pad):
    """x_pad: (M, bs, T, Din) with Din = d_pad + C_OUT (padded layout) -> (M, bs, T, 2H)."""
    M, bs, T, Din = x_pad.shape
    H = LSTM_HIDDEN

    def pad_w_ih(w_ih, d):
        # Map original input cols [0:d]->[0:d] and [d:d+512]->[d_pad:d_pad+512];
        # zero columns kill the kernel's padded/garbage relation columns.
        w = jnp.zeros((4 * H, Din), jnp.float32)
        w = w.at[:, :d].set(w_ih[:, :d].astype(jnp.float32))
        w = w.at[:, d_pad:].set(w_ih[:, d:].astype(jnp.float32))
        return w

    w_ih_g = jnp.stack(
        [pad_w_ih(p["w_ih_f"], d) for p, d in zip(params_list, d_list)]
        + [pad_w_ih(p["w_ih_b"], d) for p, d in zip(params_list, d_list)])   # (2M, 4H, Din)
    w_hh_g = jnp.stack(
        [p["w_hh_f"].astype(jnp.float32) for p in params_list]
        + [p["w_hh_b"].astype(jnp.float32) for p in params_list])            # (2M, 4H, H)
    bias_g = jnp.stack(
        [(p["b_ih_f"] + p["b_hh_f"]).astype(jnp.float32) for p in params_list]
        + [(p["b_ih_b"] + p["b_hh_b"]).astype(jnp.float32) for p in params_list])  # (2M, 4H)

    x_g = jnp.concatenate([x_pad, x_pad[:, :, ::-1, :]], axis=0)             # (2M, bs, T, Din)

    # Hoisted input projection for all timesteps (one big batched matmul).
    xproj = jnp.einsum("gbtd,ghd->gbth", x_g, w_ih_g) + bias_g[:, None, None, :]
    xproj_t = jnp.moveaxis(xproj, 2, 0)                                       # (T, 2M, bs, 4H)

    def step(carry, xt):
        h, c = carry                                                          # (2M, bs, H)
        gates = xt + jnp.einsum("gbh,gkh->gbk", h, w_hh_g)                    # (2M, bs, 4H)
        i, f, g, o = jnp.split(gates, 4, axis=-1)                             # torch order i,f,g,o
        i = jax.nn.sigmoid(i)
        f = jax.nn.sigmoid(f)
        g = jnp.tanh(g)
        o = jax.nn.sigmoid(o)
        c = f * c + i * g
        h = o * jnp.tanh(c)
        return (h, c), h

    G = 2 * M
    init = (jnp.zeros((G, bs, H), jnp.float32), jnp.zeros((G, bs, H), jnp.float32))
    _, hs = lax.scan(step, init, xproj_t)                                     # (T, 2M, bs, H)
    hs = jnp.moveaxis(hs, 0, 2)                                               # (2M, bs, T, H)
    fwd = hs[:M]
    bwd = hs[M:][:, :, ::-1, :]
    return jnp.concatenate([fwd, bwd], axis=-1)                               # (M, bs, T, 2H)


def lg_scene_seg(params, place, cast, action, audio, *, compute_dtype=None):
    if compute_dtype is None:
        compute_dtype = _RELATION_COMPUTE_DTYPE
    names = ("place", "cast", "action", "audio")
    xs = [place, cast, action, audio]
    plist = [params[n] for n in names]
    bs, seq = place.shape[0], place.shape[1]

    x_all, N, d_pad, d_list, block_rows = _stack_boundary_inputs(xs)
    kp = _stack_boundary_params(plist, d_list)
    bn = boundary_fused(x_all, *kp, block_rows=block_rows,
                        compute_dtype=compute_dtype)                          # (M, n_pad, d_pad+512)
    bn = bn[:, :N, :].reshape(len(names), bs, seq, d_pad + C_OUT)

    lstm_out = batched_bilstm(bn, plist, d_list, d_pad)                       # (M, bs, seq, 2H)

    fc1_w = jnp.stack([p["fc1_w"].astype(jnp.float32) for p in plist])        # (M, 100, 2H)
    fc1_b = jnp.stack([p["fc1_b"].astype(jnp.float32) for p in plist])
    fc2_w = jnp.stack([p["fc2_w"].astype(jnp.float32) for p in plist])        # (M, 2, 100)
    fc2_b = jnp.stack([p["fc2_b"].astype(jnp.float32) for p in plist])
    h1 = jax.nn.relu(jnp.einsum("mbth,mkh->mbtk", lstm_out, fc1_w)
                     + fc1_b[:, None, None, :])
    out = jnp.einsum("mbtk,mck->mbtc", h1, fc2_w) + fc2_b[:, None, None, :]   # (M, bs, T, 2)
    return jnp.sum(out, axis=0).reshape(-1, 2)


# ---------------------------------------------------------------------------
# Pure-JAX references (for correctness checks)
# ---------------------------------------------------------------------------
def boundary_relation_ref(x2, w0, w1, b):
    y = (x2[0][:, None, :] * w0[None, :, None]
         + x2[1][:, None, :] * w1[None, :, None]
         + b[None, :, None])
    return jnp.max(y, axis=1)


def boundary_difference_ref(x2, w, b, eps=1e-8):
    a = x2[0][:, None, :] * w[None, :, None] + b[None, :, None]               # (N, C, D)
    c = x2[1][:, None, :] * w[None, :, None] + b[None, :, None]
    num = jnp.sum(a * c, axis=-1)
    na = jnp.sqrt(jnp.sum(a * a, axis=-1))
    nb = jnp.sqrt(jnp.sum(c * c, axis=-1))
    # torch F.cosine_similarity: clamp each norm separately.
    return num / (jnp.maximum(na, eps) * jnp.maximum(nb, eps))


def _lstm_single_direction(x, w_ih, w_hh, b_ih, b_hh):
    bs = x.shape[0]
    hidden = w_hh.shape[1]
    xs = jnp.swapaxes(x, 0, 1)                                                # (T, bs, in)

    def step(carry, xt):
        h, c = carry
        gates = xt @ w_ih.T + b_ih + h @ w_hh.T + b_hh
        i, f, g, o = jnp.split(gates, 4, axis=-1)
        i = jax.nn.sigmoid(i)
        f = jax.nn.sigmoid(f)
        g = jnp.tanh(g)
        o = jax.nn.sigmoid(o)
        c = f * c + i * g
        h = o * jnp.tanh(c)
        return (h, c), h

    init = (jnp.zeros((bs, hidden), x.dtype), jnp.zeros((bs, hidden), x.dtype))
    _, hs = lax.scan(step, init, xs)
    return jnp.swapaxes(hs, 0, 1)


def lg_scene_seg_ref(params, place, cast, action, audio):
    names = ("place", "cast", "action", "audio")
    xs = (place, cast, action, audio)
    bs, seq = place.shape[0], place.shape[1]
    total = 0.0
    for n, x in zip(names, xs):
        p = params[n]
        N, d = bs * seq, x.shape[-1]
        x2 = jnp.transpose(x.reshape(N, 2, d), (1, 0, 2))
        br = boundary_relation_ref(x2, p["rel_w0"], p["rel_w1"], p["rel_b"])
        bd = boundary_difference_ref(x2, p["diff_w"], p["diff_b"])
        bn = jnp.concatenate([br, bd], axis=1).reshape(bs, seq, -1)
        fwd = _lstm_single_direction(bn, p["w_ih_f"], p["w_hh_f"], p["b_ih_f"], p["b_hh_f"])
        bwd = _lstm_single_direction(bn[:, ::-1, :], p["w_ih_b"], p["w_hh_b"],
                                     p["b_ih_b"], p["b_hh_b"])[:, ::-1, :]
        out = jnp.concatenate([fwd, bwd], axis=-1)
        out = jax.nn.relu(out @ p["fc1_w"].T + p["fc1_b"])
        out = out @ p["fc2_w"].T + p["fc2_b"]
        total = total + out.reshape(-1, 2)
    return total


# ---------------------------------------------------------------------------
# Parameter init
# ---------------------------------------------------------------------------
def _init_branch_params(key, d):
    ks = jax.random.split(key, 16)
    in_dim = d + C_OUT
    h = LSTM_HIDDEN

    def n(k, shape, scale):
        return scale * jax.random.normal(k, shape, dtype=jnp.float32)

    rel_w = n(ks[0], (C_OUT, 1, 2, 1), 0.1)        # PyTorch Conv2d(1,512,(2,1)) weight
    diff_w = n(ks[2], (C_OUT, 1, 1, 1), 0.1)       # PyTorch Conv2d(1,512,(1,1)) weight
    return {
        "rel_w0": rel_w[:, 0, 0, 0],
        "rel_w1": rel_w[:, 0, 1, 0],
        "rel_b": n(ks[1], (C_OUT,), 0.1),
        "diff_w": diff_w[:, 0, 0, 0],
        "diff_b": n(ks[3], (C_OUT,), 0.1),
        "w_ih_f": n(ks[4], (4 * h, in_dim), 0.02),
        "w_hh_f": n(ks[5], (4 * h, h), 0.02),
        "b_ih_f": n(ks[6], (4 * h,), 0.02),
        "b_hh_f": n(ks[7], (4 * h,), 0.02),
        "w_ih_b": n(ks[8], (4 * h, in_dim), 0.02),
        "w_hh_b": n(ks[9], (4 * h, h), 0.02),
        "b_ih_b": n(ks[10], (4 * h,), 0.02),
        "b_hh_b": n(ks[11], (4 * h,), 0.02),
        "fc1_w": n(ks[12], (FC_HIDDEN, 2 * h), 0.05),
        "fc1_b": n(ks[13], (FC_HIDDEN,), 0.05),
        "fc2_w": n(ks[14], (2, FC_HIDDEN), 0.05),
        "fc2_b": n(ks[15], (2,), 0.05),
    }


if __name__ == "__main__":
    key = jax.random.PRNGKey(0)
    bs, seq = 2, 8
    dims = {"place": 128, "cast": 64, "action": 64, "audio": 32}
    names = list(dims.keys())

    keys = jax.random.split(key, 2 * len(dims) + 1)
    params, inputs = {}, {}
    ki = 0
    for name, d in dims.items():
        params[name] = _init_branch_params(keys[ki], d); ki += 1
        inputs[name] = jax.random.normal(keys[ki], (bs, seq, 2, d), dtype=jnp.float32); ki += 1

    plist = [params[n] for n in names]
    xs = [inputs[n] for n in names]
    N = bs * seq

    # --- fused f32 kernel vs pure-JAX references, per modality ---
    x_all, _, d_pad, d_list, block_rows = _stack_boundary_inputs(xs)
    kp = _stack_boundary_params(plist, d_list)
    fused = jax.block_until_ready(
        boundary_fused(x_all, *kp, block_rows=block_rows, compute_dtype=jnp.float32))
    assert fused.shape == (4, _round_up(N, block_rows), d_pad + C_OUT)
    for mi, (name, d) in enumerate(dims.items()):
        x2 = jnp.transpose(xs[mi].reshape(N, 2, d), (1, 0, 2))
        br_ref = boundary_relation_ref(x2, plist[mi]["rel_w0"], plist[mi]["rel_w1"],
                                       plist[mi]["rel_b"])
        bd_ref = boundary_difference_ref(x2, plist[mi]["diff_w"], plist[mi]["diff_b"])
        assert jnp.allclose(fused[mi, :N, :d], br_ref, atol=1e-5, rtol=1e-5), name
        # algebraic expansion + rsqrt path -> slightly looser tolerance on cos in [-1,1]
        assert jnp.allclose(fused[mi, :N, d_pad:], bd_ref, atol=2e-3, rtol=2e-3), name

    # --- bf16 relation path (only where the VPU has bf16: v6e / v7x) ---
    if _RELATION_COMPUTE_DTYPE == jnp.bfloat16:
        fused_bf = jax.block_until_ready(
            boundary_fused(x_all, *kp, block_rows=block_rows, compute_dtype=jnp.bfloat16))
        for mi, (name, d) in enumerate(dims.items()):
            x2 = jnp.transpose(xs[mi].reshape(N, 2, d), (1, 0, 2))
            br_ref = boundary_relation_ref(x2, plist[mi]["rel_w0"], plist[mi]["rel_w1"],
                                           plist[mi]["rel_b"])
            assert jnp.allclose(fused_bf[mi, :N, :d], br_ref, atol=3e-2, rtol=3e-2), name

    # --- multi-row-block grid + heterogeneous D / row padding path ---
    bs2, seq2 = 3, 9
    dims2 = [96, 40, 200, 32]
    k2 = jax.random.split(keys[-1], len(dims2))
    xs2 = [jax.random.normal(k2[i], (bs2, seq2, 2, d), dtype=jnp.float32)
           for i, d in enumerate(dims2)]
    x_all2, N2, d_pad2, d_list2, br2 = _stack_boundary_inputs(xs2, max_block_rows=8)
    kp2 = _stack_boundary_params(plist, d_list2)
    fused2 = jax.block_until_ready(
        boundary_fused(x_all2, *kp2, block_rows=br2, compute_dtype=jnp.float32))
    for mi, d in enumerate(dims2):
        x2 = jnp.transpose(xs2[mi].reshape(N2, 2, d), (1, 0, 2))
        assert jnp.allclose(
            fused2[mi, :N2, :d],
            boundary_relation_ref(x2, plist[mi]["rel_w0"], plist[mi]["rel_w1"],
                                  plist[mi]["rel_b"]), atol=1e-5, rtol=1e-5)
        assert jnp.allclose(
            fused2[mi, :N2, d_pad2:],
            boundary_difference_ref(x2, plist[mi]["diff_w"], plist[mi]["diff_b"]),
            atol=2e-3, rtol=2e-3)

    # --- full LGSceneSeg forward: f32 path vs an unbatched pure-JAX reference ---
    fwd_f32 = jax.jit(functools.partial(lg_scene_seg, compute_dtype=jnp.float32))
    out_f32 = jax.block_until_ready(
        fwd_f32(params, inputs["place"], inputs["cast"], inputs["action"], inputs["audio"]))
    out_ref = lg_scene_seg_ref(params, inputs["place"], inputs["cast"],
                               inputs["action"], inputs["audio"])
    assert out_f32.shape == (bs * seq, 2)
    assert jnp.allclose(out_f32, out_ref, atol=1e-2, rtol=1e-2)   # structural check

    # --- full forward with the per-chip default relation compute dtype ---
    out = jax.jit(lg_scene_seg)(params, inputs["place"], inputs["cast"],
                                inputs["action"], inputs["audio"])
    out = jax.block_until_ready(out)
    assert out.shape == (bs * seq, 2)
    assert bool(jnp.all(jnp.isfinite(out)))

    print("KERNEL_OK")
</pallas_src>

<mosaic_0001>
module attributes {stable_mosaic.version = 11 : i64} {
  func.func @_boundary_fused_kernel(%arg0: i32, %arg1: i32, %arg2: memref<2048xf32, #tpu.memory_space<smem>>, %arg3: memref<2048xf32, #tpu.memory_space<smem>>, %arg4: memref<2048xf32, #tpu.memory_space<smem>>, %arg5: memref<1x1x512xf32, #tpu.memory_space<vmem>>, %arg6: memref<1x1x512xf32, #tpu.memory_space<vmem>>, %arg7: memref<1x1x512xf32, #tpu.memory_space<vmem>>, %arg8: memref<1x2x16x128xf32, #tpu.memory_space<vmem>>, %arg9: memref<1x16x640xf32, #tpu.memory_space<vmem>>) attributes {dimension_semantics = [#tpu.dimension_semantics<parallel>, #tpu.dimension_semantics<parallel>], iteration_bounds = array<i64: 4, 1>, scalar_prefetch = 0 : i64, scratch_operands = 0 : i64, tpu.core_type = #tpu.core_type<tc>, window_params = [{transform_indices = @transform_0, window_bounds = array<i64: 2048>}, {transform_indices = @transform_1, window_bounds = array<i64: 2048>}, {transform_indices = @transform_2, window_bounds = array<i64: 2048>}, {transform_indices = @transform_3, window_bounds = array<i64: 1, 1, 512>}, {transform_indices = @transform_4, window_bounds = array<i64: 1, 1, 512>}, {transform_indices = @transform_5, window_bounds = array<i64: 1, 1, 512>}, {transform_indices = @transform_6, window_bounds = array<i64: 1, 2, 16, 128>}, {transform_indices = @transform_7, window_bounds = array<i64: 1, 16, 640>}]} {
    %c512_i32 = arith.constant 512 : i32
    %0 = arith.muli %arg0, %c512_i32 : i32
    %c0 = arith.constant 0 : index
    %c0_0 = arith.constant 0 : index
    %c0_1 = arith.constant 0 : index
    %c0_2 = arith.constant 0 : index
    %1 = vector.load %arg8[%c0, %c0_0, %c0_1, %c0_2] : memref<1x2x16x128xf32, #tpu.memory_space<vmem>>, vector<1x1x16x128xf32>
    %2 = vector.shape_cast %1 : vector<1x1x16x128xf32> to vector<16x128xf32>
    %c0_3 = arith.constant 0 : index
    %c1 = arith.constant 1 : index
    %c0_4 = arith.constant 0 : index
    %c0_5 = arith.constant 0 : index
    %3 = vector.load %arg8[%c0_3, %c1, %c0_4, %c0_5] : memref<1x2x16x128xf32, #tpu.memory_space<vmem>>, vector<1x1x16x128xf32>
    %4 = vector.shape_cast %3 : vector<1x1x16x128xf32> to vector<16x128xf32>
    %c0_i32 = arith.constant 0 : i32
    %5 = arith.addi %0, %c0_i32 : i32
    %6 = arith.index_cast %5 : i32 to index
    %7 = memref.load %arg2[%6] : memref<2048xf32, #tpu.memory_space<smem>>
    %8 = vector.broadcast %7 : f32 to vector<16x128xf32>
    %9 = arith.mulf %8, %2 : vector<16x128xf32>
    %10 = arith.index_cast %5 : i32 to index
    %11 = memref.load %arg3[%10] : memref<2048xf32, #tpu.memory_space<smem>>
    %12 = vector.broadcast %11 : f32 to vector<16x128xf32>
    %13 = arith.mulf %12, %4 : vector<16x128xf32>
    %14 = arith.addf %9, %13 : vector<16x128xf32>
    %15 = arith.index_cast %5 : i32 to index
    %16 = memref.load %arg4[%15] : memref<2048xf32, #tpu.memory_space<smem>>
    %17 = vector.broadcast %16 : f32 to vector<16x128xf32>
    %18 = arith.addf %14, %17 : vector<16x128xf32>
    %c1_i32 = arith.constant 1 : i32
    %19 = arith.addi %0, %c1_i32 : i32
    %20 = arith.index_cast %19 : i32 to index
    %21 = memref.load %arg2[%20] : memref<2048xf32, #tpu.memory_space<smem>>
    %22 = vector.broadcast %21 : f32 to vector<16x128xf32>
    %23 = arith.mulf %22, %2 : vector<16x128xf32>
    %24 = arith.index_cast %19 : i32 to index
    %25 = memref.load %arg3[%24] : memref<2048xf32, #tpu.memory_space<smem>>
    %26 = vector.broadcast %25 : f32 to vector<16x128xf32>
    %27 = arith.mulf %26, %4 : vector<16x128xf32>
    %28 = arith.addf %23, %27 : vector<16x128xf32>
    %29 = arith.index_cast %19 : i32 to index
    %30 = memref.load %arg4[%29] : memref<2048xf32, #tpu.memory_space<smem>>
    %31 = vector.broadcast %30 : f32 to vector<16x128xf32>
    %32 = arith.addf %28, %31 : vector<16x128xf32>
    %33 = arith.maximumf %18, %32 : vector<16x128xf32>
    %c2_i32 = arith.constant 2 : i32
    %34 = arith.addi %0, %c2_i32 : i32
    %35 = arith.index_cast %34 : i32 to index
    %36 = memref.load %arg2[%35] : memref<2048xf32, #tpu.memory_space<smem>>
    %37 = vector.broadcast %36 : f32 to vector<16x128xf32>
    %38 = arith.mulf %37, %2 : vector<16x128xf32>
    %39 = arith.index_cast %34 : i32 to index
    %40 = memref.load %arg3[%39] : memref<2048xf32, #tpu.memory_space<smem>>
    %41 = vector.broadcast %40 : f32 to vector<16x128xf32>
    %42 = arith.mulf %41, %4 : vector<16x128xf32>
    %43 = arith.addf %38, %42 : vector<16x128xf32>
    %44 = arith.index_cast %34 : i32 to index
    %45 = memref.load %arg4[%44] : memref<2048xf32, #tpu.memory_space<smem>>
    %46 = vector.broadcast %45 : f32 to vector<16x128xf32>
    %47 = arith.addf %43, %46 : vector<16x128xf32>
    %48 = arith.maximumf %33, %47 : vector<16x128xf32>
    %c3_i32 = arith.constant 3 : i32
    %49 = arith.addi %0, %c3_i32 : i32
    %50 = arith.index_cast %49 : i32 to index
    %51 = memref.load %arg2[%50] : memref<2048xf32, #tpu.memory_space<smem>>
    %52 = vector.broadcast %51 : f32 to vector<16x128xf32>
    %53 = arith.mulf %52, %2 : vector<16x128xf32>
    %54 = arith.index_cast %49 : i32 to index
    %55 = memref.load %arg3[%54] : memref<2048xf32, #tpu.memory_space<smem>>
    %56 = vector.broadcast %55 : f32 to vector<16x128xf32>
    %57 = arith.mulf %56, %4 : vector<16x128xf32>
    %58 = arith.addf %53, %57 : vector<16x128xf32>
    %59 = arith.index_cast %49 : i32 to index
    %60 = memref.load %arg4[%59] : memref<2048xf32, #tpu.memory_space<smem>>
    %61 = vector.broadcast %60 : f32 to vector<16x128xf32>
    %62 = arith.addf %58, %61 : vector<16x128xf32>
    %63 = arith.maximumf %48, %62 : vector<16x128xf32>
    %c4_i32 = arith.constant 4 : i32
    %64 = arith.addi %0, %c4_i32 : i32
    %65 = arith.index_cast %64 : i32 to index
    %66 = memref.load %arg2[%65] : memref<2048xf32, #tpu.memory_space<smem>>
    %67 = vector.broadcast %66 : f32 to vector<16x128xf32>
    %68 = arith.mulf %67, %2 : vector<16x128xf32>
    %69 = arith.index_cast %64 : i32 to index
    %70 = memref.load %arg3[%69] : memref<2048xf32, #tpu.memory_space<smem>>
    %71 = vector.broadcast %70 : f32 to vector<16x128xf32>
    %72 = arith.mulf %71, %4 : vector<16x128xf32>
    %73 = arith.addf %68, %72 : vector<16x128xf32>
    %74 = arith.index_cast %64 : i32 to index
    %75 = memref.load %arg4[%74] : memref<2048xf32, #tpu.memory_space<smem>>
    %76 = vector.broadcast %75 : f32 to vector<16x128xf32>
    %77 = arith.addf %73, %76 : vector<16x128xf32>
    %78 = arith.maximumf %63, %77 : vector<16x128xf32>
    %c5_i32 = arith.constant 5 : i32
    %79 = arith.addi %0, %c5_i32 : i32
    %80 = arith.index_cast %79 : i32 to index
    %81 = memref.load %arg2[%80] : memref<2048xf32, #tpu.memory_space<smem>>
    %82 = vector.broadcast %81 : f32 to vector<16x128xf32>
    %83 = arith.mulf %82, %2 : vector<16x128xf32>
    %84 = arith.index_cast %79 : i32 to index
    %85 = memref.load %arg3[%84] : memref<2048xf32, #tpu.memory_space<smem>>
    %86 = vector.broadcast %85 : f32 to vector<16x128xf32>
    %87 = arith.mulf %86, %4 : vector<16x128xf32>
    %88 = arith.addf %83, %87 : vector<16x128xf32>
    %89 = arith.index_cast %79 : i32 to index
    %90 = memref.load %arg4[%89] : memref<2048xf32, #tpu.memory_space<smem>>
    %91 = vector.broadcast %90 : f32 to vector<16x128xf32>
    %92 = arith.addf %88, %91 : vector<16x128xf32>
    %93 = arith.maximumf %78, %92 : vector<16x128xf32>
    %c6_i32 = arith.constant 6 : i32
    %94 = arith.addi %0, %c6_i32 : i32
    %95 = arith.index_cast %94 : i32 to index
    %96 = memref.load %arg2[%95] : memref<2048xf32, #tpu.memory_space<smem>>
    %97 = vector.broadcast %96 : f32 to vector<16x128xf32>
    %98 = arith.mulf %97, %2 : vector<16x128xf32>
    %99 = arith.index_cast %94 : i32 to index
    %100 = memref.load %arg3[%99] : memref<2048xf32, #tpu.memory_space<smem>>
    %101 = vector.broadcast %100 : f32 to vector<16x128xf32>
    %102 = arith.mulf %101, %4 : vector<16x128xf32>
    %103 = arith.addf %98, %102 : vector<16x128xf32>
    %104 = arith.index_cast %94 : i32 to index
    %105 = memref.load %arg4[%104] : memref<2048xf32, #tpu.memory_space<smem>>
    %106 = vector.broadcast %105 : f32 to vector<16x128xf32>
    %107 = arith.addf %103, %106 : vector<16x128xf32>
    %108 = arith.maximumf %93, %107 : vector<16x128xf32>
    %c7_i32 = arith.constant 7 : i32
    %109 = arith.addi %0, %c7_i32 : i32
    %110 = arith.index_cast %109 : i32 to index
    %111 = memref.load %arg2[%110] : memref<2048xf32, #tpu.memory_space<smem>>
    %112 = vector.broadcast %111 : f32 to vector<16x128xf32>
    %113 = arith.mulf %112, %2 : vector<16x128xf32>
    %114 = arith.index_cast %109 : i32 to index
    %115 = memref.load %arg3[%114] : memref<2048xf32, #tpu.memory_space<smem>>
    %116 = vector.broadcast %115 : f32 to vector<16x128xf32>
    %117 = arith.mulf %116, %4 : vector<16x128xf32>
    %118 = arith.addf %113, %117 : vector<16x128xf32>
    %119 = arith.index_cast %109 : i32 to index
    %120 = memref.load %arg4[%119] : memref<2048xf32, #tpu.memory_space<smem>>
    %121 = vector.broadcast %120 : f32 to vector<16x128xf32>
    %122 = arith.addf %118, %121 : vector<16x128xf32>
    %123 = arith.maximumf %108, %122 : vector<16x128xf32>
    %c1_i32_6 = arith.constant 1 : i32
    %c63_i32 = arith.constant 63 : i32
    %124 = arith.addi %c1_i32_6, %c63_i32 : i32
    %c1_i32_7 = arith.constant 1 : i32
    %125 = scf.for %arg10 = %c1_i32_6 to %124 step %c1_i32_7 iter_args(%arg11 = %123) -> (vector<16x128xf32>)  : i32 {
      %c8_i32 = arith.constant 8 : i32
      %191 = arith.muli %arg10, %c8_i32 : i32
      %c0_i32_30 = arith.constant 0 : i32
      %192 = arith.addi %191, %c0_i32_30 : i32
      %193 = arith.addi %0, %192 : i32
      %194 = arith.index_cast %193 : i32 to index
      %195 = memref.load %arg2[%194] : memref<2048xf32, #tpu.memory_space<smem>>
      %196 = vector.broadcast %195 : f32 to vector<16x128xf32>
      %197 = arith.mulf %196, %2 : vector<16x128xf32>
      %198 = arith.index_cast %193 : i32 to index
      %199 = memref.load %arg3[%198] : memref<2048xf32, #tpu.memory_space<smem>>
      %200 = vector.broadcast %199 : f32 to vector<16x128xf32>
      %201 = arith.mulf %200, %4 : vector<16x128xf32>
      %202 = arith.addf %197, %201 : vector<16x128xf32>
      %203 = arith.index_cast %193 : i32 to index
      %204 = memref.load %arg4[%203] : memref<2048xf32, #tpu.memory_space<smem>>
      %205 = vector.broadcast %204 : f32 to vector<16x128xf32>
      %206 = arith.addf %202, %205 : vector<16x128xf32>
      %207 = arith.maximumf %arg11, %206 : vector<16x128xf32>
      %c1_i32_31 = arith.constant 1 : i32
      %208 = arith.addi %191, %c1_i32_31 : i32
      %209 = arith.addi %0, %208 : i32
      %210 = arith.index_cast %209 : i32 to index
      %211 = memref.load %arg2[%210] : memref<2048xf32, #tpu.memory_space<smem>>
      %212 = vector.broadcast %211 : f32 to vector<16x128xf32>
      %213 = arith.mulf %212, %2 : vector<16x128xf32>
      %214 = arith.index_cast %209 : i32 to index
      %215 = memref.load %arg3[%214] : memref<2048xf32, #tpu.memory_space<smem>>
      %216 = vector.broadcast %215 : f32 to vector<16x128xf32>
      %217 = arith.mulf %216, %4 : vector<16x128xf32>
      %218 = arith.addf %213, %217 : vector<16x128xf32>
      %219 = arith.index_cast %209 : i32 to index
      %220 = memref.load %arg4[%219] : memref<2048xf32, #tpu.memory_space<smem>>
      %221 = vector.broadcast %220 : f32 to vector<16x128xf32>
      %222 = arith.addf %218, %221 : vector<16x128xf32>
      %223 = arith.maximumf %207, %222 : vector<16x128xf32>
      %c2_i32_32 = arith.constant 2 : i32
      %224 = arith.addi %191, %c2_i32_32 : i32
      %225 = arith.addi %0, %224 : i32
      %226 = arith.index_cast %225 : i32 to index
      %227 = memref.load %arg2[%226] : memref<2048xf32, #tpu.memory_space<smem>>
      %228 = vector.broadcast %227 : f32 to vector<16x128xf32>
      %229 = arith.mulf %228, %2 : vector<16x128xf32>
      %230 = arith.index_cast %225 : i32 to index
      %231 = memref.load %arg3[%230] : memref<2048xf32, #tpu.memory_space<smem>>
      %232 = vector.broadcast %231 : f32 to vector<16x128xf32>
      %233 = arith.mulf %232, %4 : vector<16x128xf32>
      %234 = arith.addf %229, %233 : vector<16x128xf32>
      %235 = arith.index_cast %225 : i32 to index
      %236 = memref.load %arg4[%235] : memref<2048xf32, #tpu.memory_space<smem>>
      %237 = vector.broadcast %236 : f32 to vector<16x128xf32>
      %238 = arith.addf %234, %237 : vector<16x128xf32>
      %239 = arith.maximumf %223, %238 : vector<16x128xf32>
      %c3_i32_33 = arith.constant 3 : i32
      %240 = arith.addi %191, %c3_i32_33 : i32
      %241 = arith.addi %0, %240 : i32
      %242 = arith.index_cast %241 : i32 to index
      %243 = memref.load %arg2[%242] : memref<2048xf32, #tpu.memory_space<smem>>
      %244 = vector.broadcast %243 : f32 to vector<16x128xf32>
      %245 = arith.mulf %244, %2 : vector<16x128xf32>
      %246 = arith.index_cast %241 : i32 to index
      %247 = memref.load %arg3[%246] : memref<2048xf32, #tpu.memory_space<smem>>
      %248 = vector.broadcast %247 : f32 to vector<16x128xf32>
      %249 = arith.mulf %248, %4 : vector<16x128xf32>
      %250 = arith.addf %245, %249 : vector<16x128xf32>
      %251 = arith.index_cast %241 : i32 to index
      %252 = memref.load %arg4[%251] : memref<2048xf32, #tpu.memory_space<smem>>
      %253 = vector.broadcast %252 : f32 to vector<16x128xf32>
      %254 = arith.addf %250, %253 : vector<16x128xf32>
      %255 = arith.maximumf %239, %254 : vector<16x128xf32>
      %c4_i32_34 = arith.constant 4 : i32
      %256 = arith.addi %191, %c4_i32_34 : i32
      %257 = arith.addi %0, %256 : i32
      %258 = arith.index_cast %257 : i32 to index
      %259 = memref.load %arg2[%258] : memref<2048xf32, #tpu.memory_space<smem>>
      %260 = vector.broadcast %259 : f32 to vector<16x128xf32>
      %261 = arith.mulf %260, %2 : vector<16x128xf32>
      %262 = arith.index_cast %257 : i32 to index
      %263 = memref.load %arg3[%262] : memref<2048xf32, #tpu.memory_space<smem>>
      %264 = vector.broadcast %263 : f32 to vector<16x128xf32>
      %265 = arith.mulf %264, %4 : vector<16x128xf32>
      %266 = arith.addf %261, %265 : vector<16x128xf32>
      %267 = arith.index_cast %257 : i32 to index
      %268 = memref.load %arg4[%267] : memref<2048xf32, #tpu.memory_space<smem>>
      %269 = vector.broadcast %268 : f32 to vector<16x128xf32>
      %270 = arith.addf %266, %269 : vector<16x128xf32>
      %271 = arith.maximumf %255, %270 : vector<16x128xf32>
      %c5_i32_35 = arith.constant 5 : i32
      %272 = arith.addi %191, %c5_i32_35 : i32
      %273 = arith.addi %0, %272 : i32
      %274 = arith.index_cast %273 : i32 to index
      %275 = memref.load %arg2[%274] : memref<2048xf32, #tpu.memory_space<smem>>
      %276 = vector.broadcast %275 : f32 to vector<16x128xf32>
      %277 = arith.mulf %276, %2 : vector<16x128xf32>
      %278 = arith.index_cast %273 : i32 to index
      %279 = memref.load %arg3[%278] : memref<2048xf32, #tpu.memory_space<smem>>
      %280 = vector.broadcast %279 : f32 to vector<16x128xf32>
      %281 = arith.mulf %280, %4 : vector<16x128xf32>
      %282 = arith.addf %277, %281 : vector<16x128xf32>
      %283 = arith.index_cast %273 : i32 to index
      %284 = memref.load %arg4[%283] : memref<2048xf32, #tpu.memory_space<smem>>
      %285 = vector.broadcast %284 : f32 to vector<16x128xf32>
      %286 = arith.addf %282, %285 : vector<16x128xf32>
      %287 = arith.maximumf %271, %286 : vector<16x128xf32>
      %c6_i32_36 = arith.constant 6 : i32
      %288 = arith.addi %191, %c6_i32_36 : i32
      %289 = arith.addi %0, %288 : i32
      %290 = arith.index_cast %289 : i32 to index
      %291 = memref.load %arg2[%290] : memref<2048xf32, #tpu.memory_space<smem>>
      %292 = vector.broadcast %291 : f32 to vector<16x128xf32>
      %293 = arith.mulf %292, %2 : vector<16x128xf32>
      %294 = arith.index_cast %289 : i32 to index
      %295 = memref.load %arg3[%294] : memref<2048xf32, #tpu.memory_space<smem>>
      %296 = vector.broadcast %295 : f32 to vector<16x128xf32>
      %297 = arith.mulf %296, %4 : vector<16x128xf32>
      %298 = arith.addf %293, %297 : vector<16x128xf32>
      %299 = arith.index_cast %289 : i32 to index
      %300 = memref.load %arg4[%299] : memref<2048xf32, #tpu.memory_space<smem>>
      %301 = vector.broadcast %300 : f32 to vector<16x128xf32>
      %302 = arith.addf %298, %301 : vector<16x128xf32>
      %303 = arith.maximumf %287, %302 : vector<16x128xf32>
      %c7_i32_37 = arith.constant 7 : i32
      %304 = arith.addi %191, %c7_i32_37 : i32
      %305 = arith.addi %0, %304 : i32
      %306 = arith.index_cast %305 : i32 to index
      %307 = memref.load %arg2[%306] : memref<2048xf32, #tpu.memory_space<smem>>
      %308 = vector.broadcast %307 : f32 to vector<16x128xf32>
      %309 = arith.mulf %308, %2 : vector<16x128xf32>
      %310 = arith.index_cast %305 : i32 to index
      %311 = memref.load %arg3[%310] : memref<2048xf32, #tpu.memory_space<smem>>
      %312 = vector.broadcast %311 : f32 to vector<16x128xf32>
      %313 = arith.mulf %312, %4 : vector<16x128xf32>
      %314 = arith.addf %309, %313 : vector<16x128xf32>
      %315 = arith.index_cast %305 : i32 to index
      %316 = memref.load %arg4[%315] : memref<2048xf32, #tpu.memory_space<smem>>
      %317 = vector.broadcast %316 : f32 to vector<16x128xf32>
      %318 = arith.addf %314, %317 : vector<16x128xf32>
      %319 = arith.maximumf %303, %318 : vector<16x128xf32>
      scf.yield %319 : vector<16x128xf32>
    }
    %c63_i32_8 = arith.constant 63 : i32
    %c0_9 = arith.constant 0 : index
    %c0_10 = arith.constant 0 : index
    %c0_11 = arith.constant 0 : index
    %126 = vector.load %arg9[%c0_9, %c0_10, %c0_11] : memref<1x16x640xf32, #tpu.memory_space<vmem>>, vector<1x16x128xf32>
    %127 = vector.shape_cast %126 : vector<1x16x128xf32> to vector<16x128xf32>
    %128 = vector.shape_cast %125 : vector<16x128xf32> to vector<1x16x128xf32>
    tpu.vector_store %arg9[%c0_9, %c0_10, %c0_11], %128 {strides = array<i32>} : memref<1x16x640xf32, #tpu.memory_space<vmem>>, vector<1x16x128xf32>,
    %129 = arith.mulf %2, %2 : vector<16x128xf32>
    %cst = arith.constant dense<0.000000e+00> : vector<16xf32>
    %130 = vector.multi_reduction <add>, %129, %cst [1] : vector<16x128xf32> to vector<16xf32>
    %131 = vector.shape_cast %130 : vector<16xf32> to vector<16x1xf32>
    %132 = arith.mulf %4, %4 : vector<16x128xf32>
    %cst_12 = arith.constant dense<0.000000e+00> : vector<16xf32>
    %133 = vector.multi_reduction <add>, %132, %cst_12 [1] : vector<16x128xf32> to vector<16xf32>
    %134 = vector.shape_cast %133 : vector<16xf32> to vector<16x1xf32>
    %135 = arith.mulf %2, %4 : vector<16x128xf32>
    %cst_13 = arith.constant dense<0.000000e+00> : vector<16xf32>
    %136 = vector.multi_reduction <add>, %135, %cst_13 [1] : vector<16x128xf32> to vector<16xf32>
    %137 = vector.shape_cast %136 : vector<16xf32> to vector<16x1xf32>
    %cst_14 = arith.constant dense<0.000000e+00> : vector<16xf32>
    %138 = vector.multi_reduction <add>, %2, %cst_14 [1] : vector<16x128xf32> to vector<16xf32>
    %139 = vector.shape_cast %138 : vector<16xf32> to vector<16x1xf32>
    %cst_15 = arith.constant dense<0.000000e+00> : vector<16xf32>
    %140 = vector.multi_reduction <add>, %4, %cst_15 [1] : vector<16x128xf32> to vector<16xf32>
    %141 = vector.shape_cast %140 : vector<16xf32> to vector<16x1xf32>
    %142 = arith.addf %139, %141 : vector<16x1xf32>
    %cst_16 = arith.constant 5.000000e-01 : f32
    %143 = vector.broadcast %cst_16 : f32 to vector<16x1xf32>
    %144 = arith.mulf %142, %143 : vector<16x1xf32>
    %c0_17 = arith.constant 0 : index
    %c0_18 = arith.constant 0 : index
    %c0_19 = arith.constant 0 : index
    %145 = vector.load %arg5[%c0_17, %c0_18, %c0_19] : memref<1x1x512xf32, #tpu.memory_space<vmem>>, vector<1x1x512xf32>
    %146 = vector.shape_cast %145 : vector<1x1x512xf32> to vector<1x512xf32>
    %147 = vector.shape_cast %146 : vector<1x512xf32> to vector<1x512xf32>
    %148 = vector.broadcast %147 : vector<1x512xf32> to vector<16x512xf32>
    %c0_20 = arith.constant 0 : index
    %c0_21 = arith.constant 0 : index
    %c0_22 = arith.constant 0 : index
    %149 = vector.load %arg6[%c0_20, %c0_21, %c0_22] : memref<1x1x512xf32, #tpu.memory_space<vmem>>, vector<1x1x512xf32>
    %150 = vector.shape_cast %149 : vector<1x1x512xf32> to vector<1x512xf32>
    %151 = vector.shape_cast %150 : vector<1x512xf32> to vector<1x512xf32>
    %152 = vector.broadcast %151 : vector<1x512xf32> to vector<16x512xf32>
    %c0_23 = arith.constant 0 : index
    %c0_24 = arith.constant 0 : index
    %c0_25 = arith.constant 0 : index
    %153 = vector.load %arg7[%c0_23, %c0_24, %c0_25] : memref<1x1x512xf32, #tpu.memory_space<vmem>>, vector<1x1x512xf32>
    %154 = vector.shape_cast %153 : vector<1x1x512xf32> to vector<1x512xf32>
    %155 = vector.shape_cast %154 : vector<1x512xf32> to vector<1x512xf32>
    %156 = vector.broadcast %155 : vector<1x512xf32> to vector<16x512xf32>
    %157 = vector.shape_cast %137 : vector<16x1xf32> to vector<16x1xf32>
    %158 = vector.broadcast %157 : vector<16x1xf32> to vector<16x512xf32>
    %159 = vector.shape_cast %144 : vector<16x1xf32> to vector<16x1xf32>
    %160 = vector.broadcast %159 : vector<16x1xf32> to vector<16x512xf32>
    %161 = vector.shape_cast %131 : vector<16x1xf32> to vector<16x1xf32>
    %162 = vector.broadcast %161 : vector<16x1xf32> to vector<16x512xf32>
    %163 = vector.shape_cast %134 : vector<16x1xf32> to vector<16x1xf32>
    %164 = vector.broadcast %163 : vector<16x1xf32> to vector<16x512xf32>
    %165 = vector.shape_cast %139 : vector<16x1xf32> to vector<16x1xf32>
    %166 = vector.broadcast %165 : vector<16x1xf32> to vector<16x512xf32>
    %167 = vector.shape_cast %141 : vector<16x1xf32> to vector<16x1xf32>
    %168 = vector.broadcast %167 : vector<16x1xf32> to vector<16x512xf32>
    %169 = arith.mulf %148, %158 : vector<16x512xf32>
    %170 = arith.mulf %152, %160 : vector<16x512xf32>
    %171 = arith.addf %169, %170 : vector<16x512xf32>
    %172 = arith.addf %171, %156 : vector<16x512xf32>
    %173 = arith.mulf %148, %162 : vector<16x512xf32>
    %174 = arith.mulf %152, %166 : vector<16x512xf32>
    %175 = arith.addf %173, %174 : vector<16x512xf32>
    %176 = arith.addf %175, %156 : vector<16x512xf32>
    %cst_26 = arith.constant 1.000000e-16 : f32
    %177 = vector.broadcast %cst_26 : f32 to vector<16x512xf32>
    %178 = arith.maximumf %176, %177 : vector<16x512xf32>
    %179 = arith.mulf %148, %164 : vector<16x512xf32>
    %180 = arith.mulf %152, %168 : vector<16x512xf32>
    %181 = arith.addf %179, %180 : vector<16x512xf32>
    %182 = arith.addf %181, %156 : vector<16x512xf32>
    %cst_27 = arith.constant 1.000000e-16 : f32
    %183 = vector.broadcast %cst_27 : f32 to vector<16x512xf32>
    %184 = arith.maximumf %182, %183 : vector<16x512xf32>
    %185 = arith.mulf %178, %184 : vector<16x512xf32>
    %186 = math.rsqrt %185 : vector<16x512xf32>
    %187 = arith.mulf %172, %186 : vector<16x512xf32>
    %c0_28 = arith.constant 0 : index
    %c0_29 = arith.constant 0 : index
    %c128 = arith.constant 128 : index
    %188 = vector.load %arg9[%c0_28, %c0_29, %c128] : memref<1x16x640xf32, #tpu.memory_space<vmem>>, vector<1x16x512xf32>
    %189 = vector.shape_cast %188 : vector<1x16x512xf32> to vector<16x512xf32>
    %190 = vector.shape_cast %187 : vector<16x512xf32> to vector<1x16x512xf32>
    tpu.vector_store %arg9[%c0_28, %c0_29, %c128], %190 {strides = array<i32>} : memref<1x16x640xf32, #tpu.memory_space<vmem>>, vector<1x16x512xf32>,
    return
  }
  func.func @transform_0(%arg0: i32, %arg1: i32) -> i32 {
    %c0_i32 = arith.constant 0 : i32
    %c0_i32_0 = arith.constant 0 : i32
    return %c0_i32 : i32
  }
  func.func @transform_1(%arg0: i32, %arg1: i32) -> i32 {
    %c0_i32 = arith.constant 0 : i32
    %c0_i32_0 = arith.constant 0 : i32
    return %c0_i32 : i32
  }
  func.func @transform_2(%arg0: i32, %arg1: i32) -> i32 {
    %c0_i32 = arith.constant 0 : i32
    %c0_i32_0 = arith.constant 0 : i32
    return %c0_i32 : i32
  }
  func.func @transform_3(%arg0: i32, %arg1: i32) -> (i32, i32, i32) {
    %c0_i32 = arith.constant 0 : i32
    %c0_i32_0 = arith.constant 0 : i32
    %c0_i32_1 = arith.constant 0 : i32
    return %arg0, %c0_i32, %c0_i32_0 : i32, i32, i32
  }
  func.func @transform_4(%arg0: i32, %arg1: i32) -> (i32, i32, i32) {
    %c0_i32 = arith.constant 0 : i32
    %c0_i32_0 = arith.constant 0 : i32
    %c0_i32_1 = arith.constant 0 : i32
    return %arg0, %c0_i32, %c0_i32_0 : i32, i32, i32
  }
  func.func @transform_5(%arg0: i32, %arg1: i32) -> (i32, i32, i32) {
    %c0_i32 = arith.constant 0 : i32
    %c0_i32_0 = arith.constant 0 : i32
    %c0_i32_1 = arith.constant 0 : i32
    return %arg0, %c0_i32, %c0_i32_0 : i32, i32, i32
  }
  func.func @transform_6(%arg0: i32, %arg1: i32) -> (i32, i32, i32, i32) {
    %c0_i32 = arith.constant 0 : i32
    %c0_i32_0 = arith.constant 0 : i32
    %c0_i32_1 = arith.constant 0 : i32
    return %arg0, %c0_i32, %arg1, %c0_i32_0 : i32, i32, i32, i32
  }
  func.func @transform_7(%arg0: i32, %arg1: i32) -> (i32, i32, i32) {
    %c0_i32 = arith.constant 0 : i32
    %c0_i32_0 = arith.constant 0 : i32
    return %arg0, %arg1, %c0_i32 : i32, i32, i32
  }
}

</mosaic_0001>

<bundles_post_ra>
// kernel: tpu_custom_call.1
= control target key start
LH: loop header
LB: loop body
LE: loop exit
PB: predicated region body
PF: predicated region fallthrough
CT: control target
= control target key end

     0   :  { %s2367_s0 = inlined_call_operand.hbm [shape: f32[2048], index: 0, kind: input, shape index: {}]   ;;  %s2368_s1 = inlined_call_operand.hbm [shape: f32[2048], index: 1, kind: input, shape index: {}]   ;;  %s2369_s2 = inlined_call_operand.hbm [shape: f32[2048], index: 2, kind: input, shape index: {}]   ;;  %s2370_s3 = inlined_call_operand.hbm [shape: f32[4,1,512], index: 3, kind: input, shape index: {}]   ;;  %s2371_s4 = inlined_call_operand.hbm [shape: f32[4,1,512], index: 4, kind: input, shape index: {}]   ;;  %s2372_s5 = inlined_call_operand.hbm [shape: f32[4,1,512], index: 5, kind: input, shape index: {}]   ;;  %s2373_s6 = inlined_call_operand.hbm [shape: f32[4,2,16,128], index: 6, kind: input, shape index: {}]   ;;  %s2374_s7 = inlined_call_operand.hbm [shape: f32[4,16,640], index: 7, kind: output, shape index: {}]  }
   0x1   :  { %2383 = sst [smem:[#allocation28_spill]] %s2368_s1 }
   0x2   :  { %2384 = sst [smem:[#allocation29_spill]] %s2371_s4 }
   0x3   :  { %2385 = sst [smem:[#allocation30_spill]] %s2374_s7 }
   0x4   :  { %12 = vsyncpa [#allocation5], 0 }
   0x5   :  { %13 = vsyncpa [#allocation7], 0 }
   0x6   :  { %14 = vsyncpa [#allocation3], 0 }
   0x7   :  { %16 = vsyncpa [#allocation3 + $0x1], 0 }
   0x8   :  { %17 = vsyncpa [#allocation11], 0 }
   0x9   :  { %19 = vsyncpa [#allocation11 + $0x1], 0 }
   0xa   :  { %20 = vsyncpa [#allocation14], 0 }
   0xb   :  { %22 = vsyncpa [#allocation14 + $0x1], 0 }
   0xc   :  { %23 = vsyncpa [#allocation4], 0 }
   0xd   :  { %25 = vsyncpa [#allocation4 + $0x1], 0  ;;  %s1717_s24 = smov 0   ;;  %s1719_s25 = smov 0  }
   0xe   :  { %s1721_s26 = smov 0   ;;  %s1723_s27 = smov 0  }
   0xf   :  { %s1725_s28 = smov 0   ;;  %s1727_s29 = smov 0  }
  0x10 LB: > { %2386 = sst [smem:[#allocation22_spill]] %s1631_s24  ;;  %s1748_s30 = sadd.s32 4294967295, %s1651_s29   ;;  %s1651_s29 = sphi %s1727_s29, %s31_s29   ;;  %s1647_s28 = sphi %s1725_s28, %s2418_s28   ;;  %s1643_s27 = sphi %s1723_s27, %s2417_s27   ;;  %s1639_s26 = sphi %s1721_s26, %s2413_s26   ;;  %s1635_s25 = sphi %s1719_s25, %s2416_s25   ;;  %s1631_s24 = sphi %s1717_s24, %s2415_s24  }
  0x11   : > { %2387 = sst [smem:[#allocation23_spill]] %s1639_s26  ;;  %s1207_s8 = sadd.s32 4294967294, %s1651_s29  }
  0x12   : > { %2388 = sst [smem:[#allocation24_spill]] %s1651_s29  ;;  %p126_p0 = scmp.ne.s32.totalorder %s1635_s25, %s1631_s24 }
  0x13   : > { %p2379_p1 = scmp.eq.s32.totalorder %s1748_s30, 0  ;;  %p232_p2 = scmp.eq.s32.totalorder %s1748_s30, 3 }
  0x14   : > { %p238_p3 = scmp.eq.s32.totalorder %s1207_s8, 3  ;;  %p1208_p5 = scmp.ge.s32.totalorder %s1651_s29, 1 }
  0x15   : > { %p1757_p4 = por %p2379_p1, %p126_p0  ;;  %p245_p7 = scmp.lt.s32.totalorder %s1651_s29, 5 }
  0x16   : > { %p1762_p6 = por %p238_p3, %p126_p0  ;;  %s43_s12 = sadd.s32 1, %s1647_s28 }
  0x17   : > { %p1767_p8 = pnand %p1208_p5, %p245_p7  ;;  %p45_p11 = scmp.ge.s32.totalorder %s43_s12, 4 }
  0x18   : > { %s2390_s10 = scalar_select %p1762_p6, 1, 0 }
  0x19   : > { %p1268_p9 = pneg %p1767_p8  ;;  %s113_s14 = sadd.s32 1, %s1639_s26 }
  0x1a   : > { %2391 = sst [smem:[#allocation25_spill]] %s2390_s10  ;;  %p120_p12 = scmp.ne.s32.totalorder %s1639_s26, %s1635_s25 }
  0x1b   : > { %p1776_p10 = pnand %p1268_p9, %p2379_p1  ;;  %p121_p13 = scmp.eq.s32.totalorder %s1651_s29, 0 }
  0x1c   : > { %s1665_s15 = smov [#allocation6]   ;;  %s2394_s1 = sld [smem:[#allocation28_spill]] }
  0x1d   : > { %s2420_s12 = smov (%p45_p11, %s43_s12), 0  ;;  %p122_p0 = por %p121_p13, %p120_p12 }
  0x1e   : > { %2395 = sst [smem:[#allocation26_spill]] %s2420_s12  ;;  %p1793_p3 = por %p232_p2, %p120_p12 }
  0x1f   : > { %s110_s19 = ssub.s32 %s1647_s28, %s2420_s12  ;;  %p1298_p5 = scmp.lt.s32.totalorder %s1651_s29, 4 }
  0x20   : > { %p111_p7 = scmp.eq.s32.totalorder %s110_s19, 0  ;;  %s1801_s20 = sand.u32 1, %s1639_s26  }
  0x21   : > { %s1804_s21 = sshll.u32 %s1801_s20, 2  ;;  %s1807_s22 = sshll.u32 %s1647_s28, 6 }
  0x22   : > { %1274 = dma.hbm_to_smem (!%p1776_p10), %s2394_s1, 256, %s1665_s15, [#allocation7]  }
  0x23   : > { %s1810_s23 = scalar_select %p111_p7, %s1639_s26, %s113_s14  }
  0x24   : > { %p1812_p9 = pnand %p1298_p5, %p122_p0  ;;  %s304_s15 = sand.u32 1, %s1651_s29  }
  0x25   : > { %2397 = sst [smem:[#allocation27_spill]] %s1810_s23  ;;  %s308_s1 = scalar_lea.vmem [#allocation10], %s1804_s21 }
  0x26   : > { %s2399_s4 = sld [smem:[#allocation29_spill]]  ;;  %s316_s12 = sshll.u32 %s308_s1, 4  ;;  %s317_s12 = int_to_ptr.vmem [resolvable:$true] %s316_s12 }
  0x27   : > { %s1822_s10 = scalar_lea.sflag [#allocation11], %s304_s15  ;;  %p1411_p2 = pneg %p1812_p9 }
  0x28   : > { %s1422_s14 = scalar_lea.vmem %s317_s12, 64  ;;  %s1666_s23 = smov [#allocation10]  }
  0x29   : > { %p1423_p11 = scmp.ne.s32.totalorder %s317_s12, %s1422_s14  ;;  %s1427_s26 = sshll.u32 %s1666_s23, 4  ;;  %s1428_s26 = int_to_ptr.vmem [resolvable:$false] %s1427_s26 }
  0x2a   : > { %s1429_s24 = scalar_lea.vmem %s1428_s26, 128  ;;  %p1430_p0 = scmp.lt.s32.totalorder %s317_s12, %s1428_s26 }
  0x2b   : > { %p1425_p12 = pnand %p1423_p11, %p1411_p2  ;;  %p1431_p5 = scmp.lt.s32.totalorder %s1429_s24, %s1422_s14 }
  0x2c   : > { %s314_s19 = scalar_lea.hbm %s2399_s4, %s1807_s22 }
  0x2d   : > { %p1426_p13 = pneg %p1425_p12  ;;  %p1432_p7 = por %p1431_p5, %p1430_p0 }
  0x2f   : > { %p1433_p1 = pnand %p1432_p7, %p1426_p13 }
  0x31   : > { %1436 = shalt.err (!%p1433_p1)
}
  0x32   : > { %1284 = dma.hbm_to_vmem [thread:$0]  (!%p1812_p9), %s314_s19, 64, %s317_s12, %s1822_s10  }
  0x33   : > { %s1667_s1 = smov [#allocation2]   ;;  %s1668_s24 = smov [#allocation8]  }
  0x34   : > { %1271 = dma.hbm_to_smem (!%p1776_p10), %s2367_s0, 256, %s1667_s1, [#allocation5]  }
  0x35   : > { %1277 = dma.hbm_to_smem (!%p1776_p10), %s2369_s2, 256, %s1668_s24, [#allocation7]  }
  0x36   : > { %s295_s4 = scalar_lea.hbm %s2370_s3, %s1807_s22  ;;  %s289_s29 = scalar_lea.vmem [#allocation9], %s1804_s21 }
  0x37   : > { %s297_s7 = sshll.u32 %s289_s29, 4  ;;  %s286_s12 = scalar_lea.sflag [#allocation3], %s1801_s20  ;;  %s298_s7 = int_to_ptr.vmem [resolvable:$true] %s297_s7 }
  0x38   : > { %s1472_s19 = scalar_lea.vmem %s298_s7, 64  ;;  %s1669_s1 = smov [#allocation9]  }
  0x39   : > { %p1473_p1 = scmp.ne.s32.totalorder %s298_s7, %s1472_s19  ;;  %s1477_s13 = sshll.u32 %s1669_s1, 4  ;;  %s1478_s13 = int_to_ptr.vmem [resolvable:$false] %s1477_s13 }
  0x3a   : > { %s1479_s23 = scalar_lea.vmem %s1478_s13, 128  ;;  %p1480_p13 = scmp.lt.s32.totalorder %s298_s7, %s1478_s13 }
  0x3b   : > { %p1475_p11 = pnand %p1473_p1, %p1411_p2  ;;  %p1481_p10 = scmp.lt.s32.totalorder %s1479_s23, %s1472_s19 }
  0x3d   : > { %p1476_p12 = pneg %p1475_p11  ;;  %p1482_p0 = por %p1481_p10, %p1480_p13 }
  0x3f   : > { %p1483_p5 = pnand %p1482_p0, %p1476_p12 }
  0x41   : > { %1486 = shalt.err (!%p1483_p5)
}
  0x42   : > { %1281 = dma.hbm_to_vmem [thread:$0]  (!%p1812_p9), %s295_s4, 64, %s298_s7, %s286_s12  }
  0x43   : > { %s333_s24 = scalar_lea.hbm %s2372_s5, %s1807_s22  ;;  %s327_s26 = scalar_lea.vmem [#allocation12], %s1804_s21 }
  0x44   : > { %s335_s16 = sshll.u32 %s327_s26, 4  ;;  %s1670_s14 = smov [#allocation12]   ;;  %s336_s16 = int_to_ptr.vmem [resolvable:$true] %s335_s16 }
  0x45   : > { %s1500_s17 = scalar_lea.vmem %s336_s16, 64  ;;  %s1505_s19 = sshll.u32 %s1670_s14, 4  ;;  %s1506_s19 = int_to_ptr.vmem [resolvable:$false] %s1505_s19 }
  0x46   : > { %p1501_p7 = scmp.ne.s32.totalorder %s336_s16, %s1500_s17  ;;  %s1507_s1 = scalar_lea.vmem %s1506_s19, 128 }
  0x47   : > { %p1508_p12 = scmp.lt.s32.totalorder %s336_s16, %s1506_s19  ;;  %p1509_p13 = scmp.lt.s32.totalorder %s1507_s1, %s1500_s17 }
  0x48   : > { %p1503_p1 = pnand %p1501_p7, %p1411_p2 }
  0x49   : > { %p1510_p10 = por %p1509_p13, %p1508_p12 }
  0x4a   : > { %p1504_p11 = pneg %p1503_p1 }
  0x4c   : > { %p1511_p0 = pnand %p1510_p10, %p1504_p11 }
  0x4e   : > { %1514 = shalt.err (!%p1511_p0)
}
  0x4f   : > { %1287 = dma.hbm_to_vmem [thread:$0]  (!%p1812_p9), %s333_s24, 64, %s336_s16, %s1822_s10  }
  0x50   : > { %s1222_s4 = sshll.u32 %s1801_s20, 5  ;;  %s1243_s7 = sshll.u32 %s1647_s28, 9 }
  0x51   : > { %s354_s12 = scalar_lea.hbm %s2373_s6, %s1243_s7  ;;  %s346_s13 = scalar_lea.vmem [#allocation13], %s1222_s4 }
  0x52   : > { %s355_s23 = sshll.u32 %s346_s13, 4  ;;  %s343_s29 = scalar_lea.sflag [#allocation14], %s1801_s20  ;;  %s356_s23 = int_to_ptr.vmem [resolvable:$true] %s355_s23 }
  0x53   : > { %s1528_s15 = scalar_lea.vmem %s356_s23, 512  ;;  %s1671_s26 = smov [#allocation13]  }
  0x54   : > { %p1529_p5 = scmp.ne.s32.totalorder %s356_s23, %s1528_s15  ;;  %s1533_s17 = sshll.u32 %s1671_s26, 4  ;;  %s1534_s17 = int_to_ptr.vmem [resolvable:$false] %s1533_s17 }
  0x55   : > { %s1535_s10 = scalar_lea.vmem %s1534_s17, 1024  ;;  %p1536_p11 = scmp.lt.s32.totalorder %s356_s23, %s1534_s17 }
  0x56   : > { %p1531_p7 = pnand %p1529_p5, %p1411_p2  ;;  %p1537_p12 = scmp.lt.s32.totalorder %s1535_s10, %s1528_s15 }
  0x58   : > { %p1532_p1 = pneg %p1531_p7  ;;  %p1538_p13 = por %p1537_p12, %p1536_p11 }
  0x5a   : > { %p1539_p10 = pnand %p1538_p13, %p1532_p1 }
  0x5c   : > { %1542 = shalt.err (!%p1539_p10)
}
  0x5d   : > { %s1672_s24 = smov 128   ;;  %s1673_s16 = smov 8  }
  0x5e   : > { %1290 = dma.hbm_to_vmem [thread:$0]  (!%p1812_p9), %s354_s12, 512, %s356_s23, %s343_s29, %s1672_s24, %s1672_s24, %s1673_s16  }
  0x5f   : > { %367 = sbr.rel (%p1767_p8) target bundleno = 391 (0x187), region = 48  ;;  %p2400_p2 = scmp.eq.s32.totalorder (!%p1767_p8), %s1748_s30, 0 }
  0x64   : > { %1606 = dma.done.wait (%p2400_p2), [#allocation5], 256   ;;  %p2401_p0 = pmov %p2400_p2 }
  0x66   : > { %1608 = vsyncadd (%p2401_p0), [#allocation5], 4294967040  ;;  %p2402_p5 = pmov %p2401_p0 }
  0x67   : > { %p2403_p7 = pmov %p2401_p0 }
  0x68   : > { %1610 = dma.done.wait (%p2402_p5), [#allocation7], 512  }
  0x69   : > { %1612 = vsyncadd (%p2403_p7), [#allocation7], 4294966784  ;;  %s1886_s20 = sand.u32 1, %s1635_s25  }
  0x6a   : > { %s1889_s11 = sshll.u32 %s1886_s20, 2  ;;  %s382_s8 = scalar_lea.sflag [#allocation3], %s1886_s20 }
  0x6b   : > { %s385_s14 = scalar_lea.vmem [#allocation9], %s1889_s11 }
  0x6c   : > { %1614 = dma.done.wait (%p1757_p4), %s382_s8, 64  }
  0x6d   : > { %1616 = vsyncadd (%p1757_p4), %s382_s8, 4294967232  ;;  %s390_s19 = sand.u32 1, %s1748_s30  }
  0x6e   : > { %s391_s1 = scalar_lea.sflag [#allocation11], %s390_s19 }
  0x6f   : > { %1618 = dma.done.wait (%p1757_p4), %s391_s1, 128  }
  0x70   : > { %1620 = vsyncadd (%p1757_p4), %s391_s1, 4294967168  ;;  %s1232_s7 = sshll.u32 %s1886_s20, 5  ;;  %s409_s22 = scalar_lea.sflag [#allocation14], %s1886_s20 }
  0x71   : > { %s412_s12 = scalar_lea.vmem [#allocation13], %s1232_s7 }
  0x72   : > { %1622 = dma.done.wait (%p1757_p4), %s409_s22, 512  }
  0x73   : > { %1624 = vsyncadd (%p1757_p4), %s409_s22, 4294966784 }
  0x74   : > { %417 = sfence }
  0x75   : > { %s1244_s30 = smul.u32 80, %s1886_s20  ;;  %s1912_s13 = sshll.u32 %s1643_s27, 9  ;;  %v1921_v0 = vld [vmem:[%s412_s12] sm:$0xff]  ;;  %v1923_v1 = vld [vmem:[%s412_s12 + $0x8] sm:$0xff]  ;;  %v1925_v2 = vld [vmem:[%s412_s12 + $0x10] sm:$0xff] }
  0x76   : > { %s467_s23 = sld [smem:[#allocation2 + %s1912_s13]]  ;;  %s481_s29 = sadd.s32 1, %s1912_s13  ;;  %v1927_v3 = vld [vmem:[%s412_s12 + $0x18] sm:$0xff] }
  0x77   : > { %s471_s15 = sld [smem:[#allocation6 + %s1912_s13]]  ;;  %s498_s9 = sadd.s32 2, %s1912_s13 }
  0x78   : > { %s1918_s26 = sld [smem:[#allocation8 + %s1912_s13]]  ;;  %s515_s8 = sadd.s32 3, %s1912_s13 }
  0x79   : > { %s482_s17 = sld [smem:[#allocation2 + %s481_s29]]  ;;  %s532_s22 = sadd.s32 4, %s1912_s13 }
  0x7a   : > { %s486_s10 = sld [smem:[#allocation6 + %s481_s29]] }
  0x7b   : > { %s1929_s24 = sld [smem:[#allocation8 + %s481_s29]] }
  0x7c   : > { %v468_v4 = vstv %s467_s23  ;;  %s1931_s16 = sld [smem:[#allocation2 + %s498_s9]] }
  0x7d   : > { %v469_v5 = vmul.f32 %v468_v4, %v1921_v0  ;;  %v470_v6 = vmul.f32 %v468_v4, %v1923_v1  ;;  %v472_v7 = vstv %s471_s15  ;;  %s1936_s19 = sld [smem:[#allocation6 + %s498_s9]]  ;;  %s549_s15 = sadd.s32 5, %s1912_s13 }
  0x7e   : > { %v473_v8 = vmul.f32 %v1925_v2, %v472_v7  ;;  %v474_v9 = vmul.f32 %v1927_v3, %v472_v7  ;;  %s1940_s1 = sld [smem:[#allocation8 + %s498_s9]]  ;;  %v478_v10 = vstv %s1918_s26 }
  0x7f   : > { %v483_v11 = vstv %s482_s17  ;;  %s1943_s7 = sld [smem:[#allocation2 + %s515_s8]] }
  0x80   : > { %v475_v12 = vadd.f32 %v473_v8, %v469_v5  ;;  %v476_v13 = vadd.f32 %v474_v9, %v470_v6  ;;  %v484_v14 = vmul.f32 %v483_v11, %v1921_v0  ;;  %v485_v15 = vmul.f32 %v483_v11, %v1923_v1  ;;  %s1948_s12 = sld [smem:[#allocation6 + %s515_s8]] }
  0x81   : > { %v487_v16 = vstv %s486_s10  ;;  %s1950_s23 = sld [smem:[#allocation8 + %s515_s8]]  ;;  %v493_v19 = vstv %s1929_s24  ;;  %s566_s10 = sadd.s32 6, %s1912_s13 }
  0x82   : > { %v488_v17 = vmul.f32 %v1925_v2, %v487_v16  ;;  %v489_v18 = vmul.f32 %v1927_v3, %v487_v16  ;;  %s1955_s29 = sld [smem:[#allocation2 + %s532_s22]]  ;;  %v479_v20 = vadd.f32 %v478_v10, %v475_v12  ;;  %v480_v21 = vadd.f32 %v478_v10, %v476_v13 }
  0x83   : > { %v500_v22 = vstv %s1931_s16  ;;  %v504_v23 = vstv %s1936_s19  ;;  %s1960_s26 = sld [smem:[#allocation6 + %s532_s22]]  ;;  %s583_s19 = sadd.s32 7, %s1912_s13 }
  0x84   : > { %v490_v24 = vadd.f32 %v488_v17, %v484_v14  ;;  %v491_v25 = vadd.f32 %v489_v18, %v485_v15  ;;  %v501_v26 = vmul.f32 %v500_v22, %v1921_v0  ;;  %v502_v27 = vmul.f32 %v500_v22, %v1923_v1  ;;  %s1964_s17 = sld [smem:[#allocation8 + %s532_s22]] }
  0x85   : > { %v505_v28 = vmul.f32 %v1925_v2, %v504_v23  ;;  %v506_v29 = vmul.f32 %v1927_v3, %v504_v23  ;;  %v510_v30 = vstv %s1940_s1  ;;  %v517_v31 = vstv %s1943_s7  ;;  %s1970_s9 = sld [smem:[#allocation2 + %s549_s15]] }
  0x86   : > { %v494_v32 = vadd.f32 %v493_v19, %v490_v24  ;;  %v495_v33 = vadd.f32 %v493_v19, %v491_v25  ;;  %v518_v34 = vmul.f32 %v517_v31, %v1921_v0  ;;  %v519_v35 = vmul.f32 %v517_v31, %v1923_v1  ;;  %s1975_s24 = sld [smem:[#allocation6 + %s549_s15]] }
  0x87   : > { %v507_v36 = vadd.f32 %v505_v28, %v501_v26  ;;  %v508_v37 = vadd.f32 %v506_v29, %v502_v27  ;;  %v521_v38 = vstv %s1948_s12  ;;  %v527_v39 = vstv %s1950_s23  ;;  %s1979_s16 = sld [smem:[#allocation8 + %s549_s15]]  ;;  %s2032_s15 = smov 1  }
  0x88   : > { %v496_v40 = vmax.f32 %v479_v20, %v494_v32  ;;  %v497_v41 = vmax.f32 %v480_v21, %v495_v33  ;;  %v522_v42 = vmul.f32 %v1925_v2, %v521_v38  ;;  %v523_v43 = vmul.f32 %v1927_v3, %v521_v38  ;;  %s1983_s8 = sld [smem:[#allocation2 + %s566_s10]] }
  0x89   : > { %v511_v44 = vadd.f32 %v510_v30, %v507_v36  ;;  %v512_v45 = vadd.f32 %v510_v30, %v508_v37  ;;  %v534_v46 = vstv %s1955_s29  ;;  %v538_v47 = vstv %s1960_s26  ;;  %s1988_s1 = sld [smem:[#allocation6 + %s566_s10]]  ;;  %s2026_s29 = scalar_lea.vmem [#allocation15], %s1244_s30 }
  0x8a   : > { %v524_v48 = vadd.f32 %v522_v42, %v518_v34  ;;  %v525_v49 = vadd.f32 %v523_v43, %v519_v35  ;;  %v535_v50 = vmul.f32 %v534_v46, %v1921_v0  ;;  %v536_v51 = vmul.f32 %v534_v46, %v1923_v1  ;;  %s1992_s7 = sld [smem:[#allocation8 + %s566_s10]] }
  0x8b   : > { %v513_v52 = vmax.f32 %v496_v40, %v511_v44  ;;  %v514_v53 = vmax.f32 %v497_v41, %v512_v45  ;;  %v539_v54 = vmul.f32 %v1925_v2, %v538_v47  ;;  %v540_v55 = vmul.f32 %v1927_v3, %v538_v47  ;;  %s1996_s22 = sld [smem:[#allocation2 + %s583_s19]] }
  0x8c   : > { %v528_v56 = vadd.f32 %v527_v39, %v524_v48  ;;  %v529_v57 = vadd.f32 %v527_v39, %v525_v49  ;;  %v544_v58 = vstv %s1964_s17  ;;  %v551_v59 = vstv %s1970_s9  ;;  %s2000_s12 = sld [smem:[#allocation6 + %s583_s19]] }
  0x8d   : > { %v541_v60 = vadd.f32 %v539_v54, %v535_v50  ;;  %v542_v61 = vadd.f32 %v540_v55, %v536_v51  ;;  %v552_v62 = vmul.f32 %v551_v59, %v1921_v0  ;;  %v553_v63 = vmul.f32 %v551_v59, %v1923_v1  ;;  %s2005_s23 = sld [smem:[#allocation8 + %s583_s19]] }
  0x8e   : > { %v530_v4 = vmax.f32 %v513_v52, %v528_v56  ;;  %v531_v5 = vmax.f32 %v514_v53, %v529_v57  ;;  %v555_v6 = vstv %s1975_s24  ;;  %v561_v11 = vstv %s1979_s16 }
  0x8f   : > { %v545_v7 = vadd.f32 %v544_v58, %v541_v60  ;;  %v546_v8 = vadd.f32 %v544_v58, %v542_v61  ;;  %v556_v9 = vmul.f32 %v1925_v2, %v555_v6  ;;  %v557_v10 = vmul.f32 %v1927_v3, %v555_v6 }
  0x90   : > { %v568_v12 = vstv %s1983_s8  ;;  %v572_v13 = vstv %s1988_s1  ;;  %v578_v14 = vstv %s1992_s7 }
  0x91   : > { %v547_v15 = vmax.f32 %v530_v4, %v545_v7  ;;  %v548_v16 = vmax.f32 %v531_v5, %v546_v8  ;;  %v558_v17 = vadd.f32 %v556_v9, %v552_v62  ;;  %v559_v18 = vadd.f32 %v557_v10, %v553_v63 }
  0x92   : > { %v569_v19 = vmul.f32 %v568_v12, %v1921_v0  ;;  %v570_v20 = vmul.f32 %v568_v12, %v1923_v1  ;;  %v573_v21 = vmul.f32 %v1925_v2, %v572_v13  ;;  %v574_v22 = vmul.f32 %v1927_v3, %v572_v13 }
  0x93   : > { %v562_v23 = vadd.f32 %v561_v11, %v558_v17  ;;  %v563_v24 = vadd.f32 %v561_v11, %v559_v18  ;;  %v585_v25 = vstv %s1996_s22  ;;  %v589_v26 = vstv %s2000_s12 }
  0x94   : > { %v575_v27 = vadd.f32 %v573_v21, %v569_v19  ;;  %v576_v28 = vadd.f32 %v574_v22, %v570_v20  ;;  %v586_v29 = vmul.f32 %v585_v25, %v1921_v0  ;;  %v587_v30 = vmul.f32 %v585_v25, %v1923_v1 }
  0x95   : > { %v564_v31 = vmax.f32 %v547_v15, %v562_v23  ;;  %v565_v32 = vmax.f32 %v548_v16, %v563_v24  ;;  %v590_v33 = vmul.f32 %v1925_v2, %v589_v26  ;;  %v591_v34 = vmul.f32 %v1927_v3, %v589_v26 }
  0x96   : > { %v579_v35 = vadd.f32 %v578_v14, %v575_v27  ;;  %v580_v36 = vadd.f32 %v578_v14, %v576_v28  ;;  %v595_v37 = vstv %s2005_s23 }
  0x97   : > { %v592_v38 = vadd.f32 %v590_v33, %v586_v29  ;;  %v593_v39 = vadd.f32 %v591_v34, %v587_v30 }
  0x98   : > { %v581_v40 = vmax.f32 %v564_v31, %v579_v35  ;;  %v582_v41 = vmax.f32 %v565_v32, %v580_v36 }
  0x99   : > { %v596_v42 = vadd.f32 %v595_v37, %v592_v38  ;;  %v597_v43 = vadd.f32 %v595_v37, %v593_v39 }
  0x9b   : > { %v598_v44 = vmax.f32 %v581_v40, %v596_v42   ;;  %v599_v45 = vmax.f32 %v582_v41, %v597_v43  }
  0x9c LB: >> { %s2044_s30 = sshll.u32 %s1663_s15, 3  ;;  %s605_s15 = sadd.s32 1, %s1663_s15   ;;  %s1663_s15 = sphi %s2032_s15, %s605_s15   ;;  %v1659_v44 = vphi %v598_v44, %v2405_v44   ;;  %v1655_v45 = vphi %v599_v45, %v2404_v45  }
  0x9d   : >> { %s609_s26 = sadd.s32 %s2044_s30, %s1912_s13  ;;  %s626_s17 = sadd.s32 1, %s2044_s30 }
  0x9e   : >> { %s610_s9 = sld [smem:[#allocation2 + %s609_s26]]  ;;  %s627_s10 = sadd.s32 %s1912_s13, %s626_s17 }
  0x9f   : >> { %s614_s24 = sld [smem:[#allocation6 + %s609_s26]]  ;;  %s644_s16 = sadd.s32 2, %s2044_s30 }
  0xa0   : >> { %s2051_s8 = sld [smem:[#allocation8 + %s609_s26]]  ;;  %s645_s19 = sadd.s32 %s1912_s13, %s644_s16 }
  0xa1   : >> { %s628_s1 = sld [smem:[#allocation2 + %s627_s10]]  ;;  %s662_s7 = sadd.s32 3, %s2044_s30 }
  0xa2   : >> { %s632_s22 = sld [smem:[#allocation6 + %s627_s10]]  ;;  %s680_s23 = sadd.s32 4, %s2044_s30 }
  0xa3   : >> { %s2055_s12 = sld [smem:[#allocation8 + %s627_s10]]  ;;  %s663_s4 = sadd.s32 %s1912_s13, %s662_s7 }
  0xa4   : >> { %v611_v46 = vstv %s610_s9  ;;  %s2058_s21 = sld [smem:[#allocation2 + %s645_s19]]  ;;  %s681_s10 = sadd.s32 %s1912_s13, %s680_s23 }
  0xa5   : >> { %v612_v47 = vmul.f32 %v611_v46, %v1921_v0  ;;  %v613_v48 = vmul.f32 %v611_v46, %v1923_v1  ;;  %v615_v49 = vstv %s614_s24  ;;  %s2063_s26 = sld [smem:[#allocation6 + %s645_s19]]  ;;  %s698_s16 = sadd.s32 5, %s2044_s30 }
  0xa6   : >> { %v616_v50 = vmul.f32 %v1925_v2, %v615_v49  ;;  %v617_v51 = vmul.f32 %v1927_v3, %v615_v49  ;;  %s2067_s17 = sld [smem:[#allocation8 + %s645_s19]]  ;;  %v621_v52 = vstv %s2051_s8  ;;  %s716_s8 = sadd.s32 6, %s2044_s30 }
  0xa7   : >> { %v629_v53 = vstv %s628_s1  ;;  %s2071_s9 = sld [smem:[#allocation2 + %s663_s4]]  ;;  %s699_s7 = sadd.s32 %s1912_s13, %s698_s16 }
  0xa8   : >> { %v618_v54 = vadd.f32 %v616_v50, %v612_v47  ;;  %v619_v55 = vadd.f32 %v617_v51, %v613_v48  ;;  %v630_v56 = vmul.f32 %v629_v53, %v1921_v0  ;;  %v631_v57 = vmul.f32 %v629_v53, %v1923_v1  ;;  %s2076_s24 = sld [smem:[#allocation6 + %s663_s4]]  ;;  %p602_p4 = scmp.ge.s32.totalorder %s605_s15, 64  }
  0xa9   : >> { %v633_v58 = vstv %s632_s22  ;;  %s2078_s19 = sld [smem:[#allocation8 + %s663_s4]]  ;;  %v639_v63 = vstv %s2055_s12  ;;  %s2096_s22 = sadd.s32 %s1912_s13, %s716_s8 }
  0xaa   : >> { %v622_v59 = vadd.f32 %v621_v52, %v618_v54  ;;  %v623_v60 = vadd.f32 %v621_v52, %v619_v55  ;;  %v634_v61 = vmul.f32 %v1925_v2, %v633_v58  ;;  %v635_v62 = vmul.f32 %v1927_v3, %v633_v58  ;;  %s2083_s1 = sld [smem:[#allocation2 + %s681_s10]]  ;;  %s734_s12 = sadd.s32 7, %s2044_s30 }
  0xab   : >> { %v647_v4 = vstv %s2058_s21  ;;  %v651_v5 = vstv %s2063_s26  ;;  %s2089_s23 = sld [smem:[#allocation6 + %s681_s10]]  ;;  %s2407_s15 = scalar_lea.vmem (%p602_p4), [#allocation12], %s1889_s11 }
  0xac   : >> { %v624_v6 = vmax.f32 %v1659_v44, %v622_v59  ;;  %v625_v7 = vmax.f32 %v1655_v45, %v623_v60  ;;  %v636_v8 = vadd.f32 %v634_v61, %v630_v56  ;;  %v637_v9 = vadd.f32 %v635_v62, %v631_v57  ;;  %s2093_s4 = sld [smem:[#allocation8 + %s681_s10]] }
  0xad   : >> { %v648_v10 = vmul.f32 %v647_v4, %v1921_v0  ;;  %v649_v11 = vmul.f32 %v647_v4, %v1923_v1  ;;  %v652_v12 = vmul.f32 %v1925_v2, %v651_v5  ;;  %v653_v13 = vmul.f32 %v1927_v3, %v651_v5  ;;  %s2102_s21 = sld [smem:[#allocation2 + %s699_s7]] }
  0xae   : >> { %v640_v14 = vadd.f32 %v639_v63, %v636_v8  ;;  %v641_v15 = vadd.f32 %v639_v63, %v637_v9  ;;  %v657_v16 = vstv %s2067_s17  ;;  %v665_v17 = vstv %s2071_s9  ;;  %s2107_s26 = sld [smem:[#allocation6 + %s699_s7]]  ;;  %s2118_s17 = sadd.s32 %s1912_s13, %s734_s12 }
  0xaf   : >> { %v654_v18 = vadd.f32 %v652_v12, %v648_v10  ;;  %v655_v19 = vadd.f32 %v653_v13, %v649_v11  ;;  %v666_v20 = vmul.f32 %v665_v17, %v1921_v0  ;;  %v667_v21 = vmul.f32 %v665_v17, %v1923_v1  ;;  %s2111_s10 = sld [smem:[#allocation8 + %s699_s7]]  ;;  %s2406_s13 = scalar_lea.vmem (%p602_p4), [#allocation10], %s1889_s11 }
  0xb0   : >> { %v642_v22 = vmax.f32 %v624_v6, %v640_v14  ;;  %v643_v23 = vmax.f32 %v625_v7, %v641_v15  ;;  %v669_v24 = vstv %s2076_s24  ;;  %s2115_s30 = sld [smem:[#allocation2 + %s2096_s22]]  ;;  %v675_v29 = vstv %s2078_s19  ;;  %s1245_s11 = smul.u32 (%p602_p4), 1280, %s1643_s27 }
  0xb1   : >> { %v658_v25 = vadd.f32 %v657_v16, %v654_v18  ;;  %v659_v26 = vadd.f32 %v657_v16, %v655_v19  ;;  %v670_v27 = vmul.f32 %v1925_v2, %v669_v24  ;;  %v671_v28 = vmul.f32 %v1927_v3, %v669_v24  ;;  %s2123_s9 = sld [smem:[#allocation6 + %s2096_s22]] }
  0xb2   : >> { %v683_v30 = vstv %s2083_s1  ;;  %v687_v31 = vstv %s2089_s23  ;;  %v693_v32 = vstv %s2093_s4  ;;  %s2130_s16 = sld [smem:[#allocation8 + %s2096_s22]]  ;;  %s995_s4 = scalar_lea.sflag (%p602_p4), [#allocation4], %s1886_s20 }
  0xb3   : >> { %v660_v33 = vmax.f32 %v642_v22, %v658_v25  ;;  %v661_v34 = vmax.f32 %v643_v23, %v659_v26  ;;  %v672_v35 = vadd.f32 %v670_v27, %v666_v20  ;;  %v673_v36 = vadd.f32 %v671_v28, %v667_v21  ;;  %s2133_s24 = sld [smem:[#allocation2 + %s2118_s17]] }
  0xb4   : >> { %v684_v37 = vmul.f32 %v683_v30, %v1921_v0  ;;  %v685_v38 = vmul.f32 %v683_v30, %v1923_v1  ;;  %v688_v39 = vmul.f32 %v1925_v2, %v687_v31  ;;  %v689_v40 = vmul.f32 %v1927_v3, %v687_v31  ;;  %s2140_s19 = sld [smem:[#allocation6 + %s2118_s17]] }
  0xb5   : >> { %v676_v41 = vadd.f32 %v675_v29, %v672_v35  ;;  %v677_v42 = vadd.f32 %v675_v29, %v673_v36  ;;  %v701_v43 = vstv %s2102_s21  ;;  %v705_v44 = vstv %s2107_s26  ;;  %s2149_s8 = sld [smem:[#allocation8 + %s2118_s17]]  ;;  %s1674_s21 = smov (%p602_p4), [#allocation15]  }
  0xb6   : >> { %v690_v45 = vadd.f32 %v688_v39, %v684_v37  ;;  %v691_v46 = vadd.f32 %v689_v40, %v685_v38  ;;  %v702_v47 = vmul.f32 %v701_v43, %v1921_v0  ;;  %v703_v48 = vmul.f32 %v701_v43, %v1923_v1  ;;  %s2408_s7 = sld [smem:[#allocation30_spill]] (%p602_p4)  ;;  %s1547_s12 = sshll.u32 (%p602_p4), %s1674_s21, 4  ;;  %s1548_s12 = int_to_ptr.vmem [resolvable:$false] %s1547_s12 }
  0xb7   : >> { %v678_v49 = vmax.f32 %v660_v33, %v676_v41  ;;  %v679_v50 = vmax.f32 %v661_v34, %v677_v42  ;;  %v706_v51 = vmul.f32 %v1925_v2, %v705_v44  ;;  %v707_v52 = vmul.f32 %v1927_v3, %v705_v44  ;;  %v784_v41 = vld [vmem:[%s385_s14] sm:$0xf] (%p602_p4)  ;;  %s1011_s14 = sshll.u32 (%p602_p4), %s2026_s29, 4  ;;  %s1549_s26 = scalar_lea.vmem (%p602_p4), %s1548_s12, 2560  ;;  %s2318_s14 = int_to_ptr.vmem [resolvable:$true] %s1011_s14 }
  0xb8   : >> { %v694_v53 = vadd.f32 %v693_v32, %v690_v45  ;;  %v695_v54 = vadd.f32 %v693_v32, %v691_v46  ;;  %v711_v55 = vstv %s2111_s10  ;;  %v719_v56 = vstv %s2115_s30  ;;  %s1543_s22 = scalar_lea.vmem (%p602_p4), %s2318_s14, 1280  ;;  %p1550_p11 = scmp.lt.s32.totalorder (%p602_p4), %s2318_s14, %s1548_s12 }
  0xb9   : >> { %v708_v57 = vadd.f32 %v706_v51, %v702_v47  ;;  %v709_v58 = vadd.f32 %v707_v52, %v703_v48  ;;  %v720_v59 = vmul.f32 %v719_v56, %v1921_v0  ;;  %v721_v60 = vmul.f32 %v719_v56, %v1923_v1  ;;  %p1544_p8 = scmp.ne.s32.totalorder (%p602_p4), %s2318_s14, %s1543_s22  ;;  %p1551_p12 = scmp.lt.s32.totalorder (%p602_p4), %s1549_s26, %s1543_s22 }
  0xba   : >> { %v696_v61 = vmax.f32 %v678_v49, %v694_v53  ;;  %v697_v62 = vmax.f32 %v679_v50, %v695_v54  ;;  %v723_v63 = vstv %s2123_s9  ;;  %v729_v8 = vstv %s2130_s16 }
  0xbb   : >> { %v712_v4 = vadd.f32 %v711_v55, %v708_v57  ;;  %v713_v5 = vadd.f32 %v711_v55, %v709_v58  ;;  %v724_v6 = vmul.f32 %v1925_v2, %v723_v63  ;;  %v725_v7 = vmul.f32 %v1927_v3, %v723_v63  ;;  %p1545_p9 = pnand (%p602_p4), %p1544_p8, %p1793_p3  ;;  %p1552_p13 = por (%p602_p4), %p1551_p12, %p1550_p11 }
  0xbc   : >> { %v737_v9 = vstv %s2133_s24  ;;  %v741_v10 = vstv %s2140_s19  ;;  %v747_v21 = vstv %s2149_s8  ;;  %v760_v30 = vmul.f32 (%p602_p4), %v1925_v2, %v1925_v2  ;;  %s2315_s23 = scalar_lea.hbm (%p602_p4), %s2408_s7, %s1245_s11 }
  0xbd   : >> { %v714_v11 = vmax.f32 %v696_v61, %v712_v4  ;;  %v715_v12 = vmax.f32 %v697_v62, %v713_v5  ;;  %v726_v13 = vadd.f32 %v724_v6, %v720_v59  ;;  %v727_v14 = vadd.f32 %v725_v7, %v721_v60  ;;  %p1546_p1 = pneg (%p602_p4), %p1545_p9 }
  0xbe   : >> { %v738_v15 = vmul.f32 %v737_v9, %v1921_v0  ;;  %v739_v16 = vmul.f32 %v737_v9, %v1923_v1  ;;  %v742_v17 = vmul.f32 %v1925_v2, %v741_v10  ;;  %v743_v18 = vmul.f32 %v1927_v3, %v741_v10  ;;  %762 = vadd.xlane.f32.xlu1 (%p602_p4), %v760_v30 }
  0xbf   : >> { %v730_v19 = vadd.f32 %v729_v8, %v726_v13  ;;  %v731_v20 = vadd.f32 %v729_v8, %v727_v14  ;;  %v754_v31 = vmul.f32 (%p602_p4), %v1921_v0, %v1921_v0  ;;  %v761_v32 = vmul.f32 (%p602_p4), %v1927_v3, %v1927_v3  ;;  %p1553_p10 = pnand (%p602_p4), %p1552_p13, %p1546_p1 }
  0xc0   : >> { %v744_v22 = vadd.f32 %v742_v17, %v738_v15  ;;  %v745_v23 = vadd.f32 %v743_v18, %v739_v16  ;;  %v755_v33 = vmul.f32 (%p602_p4), %v1923_v1, %v1923_v1  ;;  %v767_v34 = vmul.f32 (%p602_p4), %v1927_v3, %v1923_v1 }
  0xc1   : >> { %v732_v24 = vmax.f32 %v714_v11, %v730_v19  ;;  %v733_v25 = vmax.f32 %v715_v12, %v731_v20  ;;  %756 = vadd.xlane.f32.xlu0 (%p602_p4), %v754_v31  ;;  %v766_v35 = vmul.f32 (%p602_p4), %v1925_v2, %v1921_v0  ;;  %v786_v36 = vlaneseq (%p602_p4) }
  0xc2   : >> { %v748_v26 = vadd.f32 %v747_v21, %v744_v22  ;;  %v749_v27 = vadd.f32 %v747_v21, %v745_v23  ;;  %604 = sbr.rel (!%p602_p4) target bundleno = 156 (0x9c), region = 151  ;;  %764 = vadd.xlane.f32.xlu1 (%p602_p4), %v761_v32 }
  0xc3   : > { %v787_v37 = vshrl.u32 (%p602_p4), %v786_v36, 7 }
  0xc4   : >> { %v750_v28 = vmax.f32 %v732_v24, %v748_v26   ;;  %v751_v29 = vmax.f32 %v733_v25, %v749_v27  }
  0xc5   : > { %758 = vadd.xlane.f32.xlu0 (%p602_p4), %v755_v33  ;;  %v788_v38 = vsub.s32 (%p602_p4), 0, %v787_v37  ;;  %v792_v39 = vsub.s32 (%p602_p4), 1, %v787_v37  ;;  %v796_v40 = vsub.s32 (%p602_p4), 2, %v787_v37  ;;  %v800_v42 = vsub.s32 (%p602_p4), 3, %v787_v37 }
  0xc6   : >> { %v2404_v45 = vmov %v751_v29  ;;  %v2405_v44 = vmov %v750_v28  ;;  %752 = vst [vmem:[%s2026_s29] sm:$0xff] (%p602_p4), %v750_v28  ;;  %753 = vst [vmem:[%s2026_s29 + $0x28] sm:$0xff] (%p602_p4), %v751_v29  ;;  %774 = vadd.xlane.f32.xlu1 (%p602_p4), %v1923_v1 }
  0xc7   : > { %v806_v45 = vld [vmem:[%s2406_s13] sm:$0xf]  ;;  %v2195_v46 = vrot.slane %v784_v41, %v788_v38  ;;  %v2197_v1 = vrot.slane %v784_v41, %v792_v39 }
  0xc8   : > { %v2205_v47 = vrot.slane %v806_v45, %v788_v38  ;;  %v2207_v48 = vrot.slane %v806_v45, %v792_v39  ;;  %v2209_v49 = vrot.slane %v806_v45, %v796_v40  ;;  %v2211_v52 = vrot.slane %v806_v45, %v800_v42 }
  0xc9   : > { %772 = vadd.xlane.f32.xlu0 %v1921_v0  ;;  %v2199_v0 = vrot.slane %v784_v41, %v796_v40 }
  0xca   : > { %778 = vadd.xlane.f32.xlu1 %v1927_v3  ;;  %v2203_v3 = vrot.slane %v784_v41, %v800_v42 }
  0xcd   : > { %776 = vadd.xlane.f32.xlu0 %v1925_v2  ;;  %v828_v2 = vld [vmem:[%s2407_s15] sm:$0xf] }
  0xce   : > { %770 = vadd.xlane.f32.xlu1 %v767_v34  ;;  %v2213_v53 = vrot.slane %v828_v2, %v788_v38  ;;  %v2215_v54 = vrot.slane %v828_v2, %v792_v39  ;;  %v2217_v55 = vrot.slane %v828_v2, %v796_v40  ;;  %v2228_v59 = vrot.slane %v828_v2, %v800_v42 }
  0xd1   : > { %768 = vadd.xlane.f32.xlu0 %v766_v35 }
 0x147   : > { %v763_v43 = vpop.xlane.xlu1 %762 }
 0x148   : > { %v2220_v56 = vmul.f32 %v2195_v46, %v763_v43  ;;  %v2223_v57 = vmul.f32 %v2197_v1, %v763_v43  ;;  %v2226_v58 = vmul.f32 %v2199_v0, %v763_v43  ;;  %v2231_v60 = vmul.f32 %v2203_v3, %v763_v43 }
 0x14a   : > { %v757_v44 = vpop.xlane.xlu0 %756 }
 0x14b   : > { %v765_v50 = vpop.xlane.xlu1 %764  ;;  %v882_v61 = vmul.f32 %v2195_v46, %v757_v44  ;;  %v883_v62 = vmul.f32 %v2197_v1, %v757_v44  ;;  %v884_v63 = vmul.f32 %v2199_v0, %v757_v44  ;;  %v885_v4 = vmul.f32 %v2203_v3, %v757_v44 }
 0x14c   : > { %v926_v5 = vmul.f32 %v2195_v46, %v765_v50  ;;  %v927_v6 = vmul.f32 %v2197_v1, %v765_v50  ;;  %v928_v7 = vmul.f32 %v2199_v0, %v765_v50  ;;  %v929_v39 = vmul.f32 %v2203_v3, %v765_v50 }
 0x14e   : > { %v759_v51 = vpop.xlane.xlu0 %758 }
 0x14f   : > { %v886_v8 = vmul.f32 %v2195_v46, %v759_v51  ;;  %v887_v9 = vmul.f32 %v2197_v1, %v759_v51  ;;  %v888_v10 = vmul.f32 %v2199_v0, %v759_v51  ;;  %v889_v11 = vmul.f32 %v2203_v3, %v759_v51  ;;  %v775_v12 = vpop.xlane.xlu1 %774 }
 0x150   : > { %v894_v14 = vmul.f32 %v2205_v47, %v775_v12  ;;  %v895_v15 = vmul.f32 %v2207_v48, %v775_v12  ;;  %v896_v16 = vmul.f32 %v2209_v49, %v775_v12  ;;  %v897_v17 = vmul.f32 %v2211_v52, %v775_v12 }
 0x152   : > { %v773_v13 = vpop.xlane.xlu0 %772  ;;  %v902_v22 = vadd.f32 %v894_v14, %v886_v8  ;;  %v903_v23 = vadd.f32 %v895_v15, %v887_v9  ;;  %v904_v24 = vadd.f32 %v896_v16, %v888_v10  ;;  %v905_v25 = vadd.f32 %v897_v17, %v889_v11 }
 0x153   : > { %v890_v18 = vmul.f32 %v2205_v47, %v773_v13  ;;  %v891_v19 = vmul.f32 %v2207_v48, %v773_v13  ;;  %v892_v20 = vmul.f32 %v2209_v49, %v773_v13  ;;  %v893_v21 = vmul.f32 %v2211_v52, %v773_v13  ;;  %v779_v30 = vpop.xlane.xlu1 %778 }
 0x154   : > { %v910_v31 = vadd.f32 %v902_v22, %v2213_v53  ;;  %v911_v32 = vadd.f32 %v903_v23, %v2215_v54  ;;  %v912_v33 = vadd.f32 %v904_v24, %v2217_v55  ;;  %v913_v34 = vadd.f32 %v905_v25, %v2228_v59 }
 0x155   : > { %v898_v26 = vadd.f32 %v890_v18, %v882_v61  ;;  %v899_v27 = vadd.f32 %v891_v19, %v883_v62  ;;  %v900_v28 = vadd.f32 %v892_v20, %v884_v63  ;;  %v901_v29 = vadd.f32 %v893_v21, %v885_v4 }
 0x156   : > { %v918_v40 = vmax.f32 %v910_v31, 1e-16  ;;  %v919_v41 = vmax.f32 %v911_v32, 1e-16  ;;  %v781_v42 = vadd.f32 %v779_v30, %v775_v12  ;;  %v920_v43 = vmax.f32 %v912_v33, 1e-16  ;;  %v777_v51 = vpop.xlane.xlu0 %776 }
 0x157   : > { %v906_v35 = vadd.f32 %v898_v26, %v2213_v53  ;;  %v907_v36 = vadd.f32 %v899_v27, %v2215_v54  ;;  %v908_v37 = vadd.f32 %v900_v28, %v2217_v55  ;;  %v909_v38 = vadd.f32 %v901_v29, %v2228_v59 }
 0x158   : > { %v921_v44 = vmax.f32 %v913_v34, 1e-16  ;;  %v934_v2 = vmul.f32 %v2205_v47, %v779_v30  ;;  %v935_v4 = vmul.f32 %v2207_v48, %v779_v30  ;;  %v783_v8 = vmul.f32 0.5, %v781_v42 }
 0x159   : > { %v914_v45 = vmax.f32 %v906_v35, 1e-16  ;;  %v915_v61 = vmax.f32 %v907_v36, 1e-16  ;;  %v916_v62 = vmax.f32 %v908_v37, 1e-16  ;;  %v936_v9 = vmul.f32 %v2209_v49, %v779_v30 }
 0x15a   : > { %v917_v63 = vmax.f32 %v909_v38, 1e-16  ;;  %v937_v10 = vmul.f32 %v2211_v52, %v779_v30  ;;  %v942_v50 = vadd.f32 %v934_v2, %v926_v5  ;;  %v943_v11 = vadd.f32 %v935_v4, %v927_v6  ;;  %v771_v38 = vpop.xlane.xlu1 %770 }
 0x15b   : > { %v930_v12 = vmul.f32 %v2205_v47, %v777_v51  ;;  %v931_v14 = vmul.f32 %v2207_v48, %v777_v51  ;;  %v932_v15 = vmul.f32 %v2209_v49, %v777_v51  ;;  %v944_v16 = vadd.f32 %v936_v9, %v928_v7 }
 0x15c   : > { %v945_v17 = vadd.f32 %v937_v10, %v929_v39  ;;  %v950_v18 = vadd.f32 %v942_v50, %v2213_v53  ;;  %v780_v19 = vadd.f32 %v777_v51, %v773_v13  ;;  %v951_v20 = vadd.f32 %v943_v11, %v2215_v54 }
 0x15d   : > { %v933_v21 = vmul.f32 %v2211_v52, %v777_v51  ;;  %v938_v22 = vadd.f32 %v930_v12, %v2220_v56  ;;  %v939_v5 = vadd.f32 %v931_v14, %v2223_v57  ;;  %v952_v6 = vadd.f32 %v944_v16, %v2217_v55  ;;  %v769_v51 = vpop.xlane.xlu0 %768 }
 0x15e   : > { %v953_v23 = vadd.f32 %v945_v17, %v2228_v59  ;;  %v958_v24 = vmax.f32 %v950_v18, 1e-16  ;;  %v940_v25 = vadd.f32 %v932_v15, %v2226_v58  ;;  %v959_v7 = vmax.f32 %v951_v20, 1e-16 }
 0x15f   : > { %v941_v26 = vadd.f32 %v933_v21, %v2231_v60  ;;  %v946_v13 = vadd.f32 %v938_v22, %v2213_v53  ;;  %v947_v27 = vadd.f32 %v939_v5, %v2215_v54  ;;  %v960_v28 = vmax.f32 %v952_v6, 1e-16 }
 0x160   : > { %v961_v29 = vmax.f32 %v953_v23, 1e-16  ;;  %v966_v30 = vmul.f32 %v958_v24, %v918_v40  ;;  %v948_v56 = vadd.f32 %v940_v25, %v2217_v55  ;;  %v967_v57 = vmul.f32 %v959_v7, %v919_v41 }
 0x161   : > { %v949_v31 = vadd.f32 %v941_v26, %v2228_v59  ;;  %v954_v32 = vmax.f32 %v946_v13, 1e-16  ;;  %v955_v33 = vmax.f32 %v947_v27, 1e-16  ;;  %v968_v34 = vmul.f32 %v960_v28, %v920_v43 }
 0x162   : > { %v969_v35 = vmul.f32 %v961_v29, %v921_v44  ;;  %1382 = vrsqrt.f32 %v966_v30  ;;  %v956_v58 = vmax.f32 %v948_v56, 1e-16  ;;  %v782_v42 = vmul.f32 0.5, %v780_v19 }
 0x163   : > { %1384 = vrsqrt.f32 %v967_v57  ;;  %v957_v60 = vmax.f32 %v949_v31, 1e-16  ;;  %v962_v36 = vmul.f32 %v954_v32, %v914_v45  ;;  %v963_v37 = vmul.f32 %v955_v33, %v915_v61 }
 0x164   : > { %1386 = vrsqrt.f32 %v968_v34  ;;  %v964_v39 = vmul.f32 %v956_v58, %v916_v62  ;;  %v862_v41 = vmul.f32 %v2205_v47, %v783_v8  ;;  %v854_v2 = vmul.f32 %v2195_v46, %v771_v38 }
 0x165   : > { %1388 = vrsqrt.f32 %v969_v35  ;;  %v965_v40 = vmul.f32 %v957_v60, %v917_v63  ;;  %v863_v43 = vmul.f32 %v2207_v48, %v783_v8  ;;  %v855_v44 = vmul.f32 %v2197_v1, %v771_v38 }
 0x166   : > { %1390 = vrsqrt.f32 %v962_v36  ;;  %v864_v45 = vmul.f32 %v2209_v49, %v783_v8  ;;  %v856_v61 = vmul.f32 %v2199_v0, %v771_v38  ;;  %v865_v62 = vmul.f32 %v2211_v52, %v783_v8 }
 0x167   : > { %1392 = vrsqrt.f32 %v963_v37  ;;  %v857_v63 = vmul.f32 %v2203_v3, %v771_v38  ;;  %v870_v4 = vadd.f32 %v862_v41, %v854_v2  ;;  %v858_v9 = vmul.f32 %v2205_v47, %v782_v42 }
 0x168   : > { %1394 = vrsqrt.f32 %v964_v39  ;;  %v850_v10 = vmul.f32 %v2195_v46, %v769_v51  ;;  %v871_v50 = vadd.f32 %v863_v43, %v855_v44  ;;  %v859_v11 = vmul.f32 %v2207_v48, %v782_v42 }
 0x169   : > { %1396 = vrsqrt.f32 %v965_v40  ;;  %v851_v12 = vmul.f32 %v2197_v1, %v769_v51  ;;  %v872_v14 = vadd.f32 %v864_v45, %v856_v61  ;;  %v860_v15 = vmul.f32 %v2209_v49, %v782_v42 }
 0x16a   : > { %v852_v16 = vmul.f32 %v2199_v0, %v769_v51  ;;  %v873_v17 = vadd.f32 %v865_v62, %v857_v63  ;;  %v861_v8 = vmul.f32 %v2211_v52, %v782_v42  ;;  %v853_v18 = vmul.f32 %v2203_v3, %v769_v51 }
 0x16b   : > { %v878_v47 = vadd.f32 %v870_v4, %v2213_v53  ;;  %v866_v19 = vadd.f32 %v858_v9, %v850_v10  ;;  %v879_v48 = vadd.f32 %v871_v50, %v2215_v54  ;;  %v867_v20 = vadd.f32 %v859_v11, %v851_v12 }
 0x16c   : > { %v880_v49 = vadd.f32 %v872_v14, %v2217_v55  ;;  %v868_v0 = vadd.f32 %v860_v15, %v852_v16  ;;  %v881_v52 = vadd.f32 %v873_v17, %v2228_v59  ;;  %v869_v5 = vadd.f32 %v861_v8, %v853_v18 }
 0x16d   : > { %v874_v24 = vadd.f32 %v866_v19, %v2213_v53  ;;  %v875_v26 = vadd.f32 %v867_v20, %v2215_v54 }
 0x16e   : > { %v876_v27 = vadd.f32 %v868_v0, %v2217_v55  ;;  %v877_v53 = vadd.f32 %v869_v5, %v2228_v59 }
 0x16f   : > { %v1383_v46 = vpop.eup %1382 }
 0x170   : > { %v1385_v1 = vpop.eup %1384  ;;  %v982_v21 = vmul.f32 %v1383_v46, %v878_v47 }
 0x171   : > { %v1387_v22 = vpop.eup %1386  ;;  %v983_v3 = vmul.f32 %v1385_v1, %v879_v48 }
 0x172   : > { %v1389_v6 = vpop.eup %1388  ;;  %v984_v23 = vmul.f32 %v1387_v22, %v880_v49  ;;  %990 = vst [vmem:[%s2026_s29 + $0x30] sm:$0xff] %v982_v21 }
 0x173   : > { %v1391_v25 = vpop.eup %1390  ;;  %v985_v7 = vmul.f32 %v1389_v6, %v881_v52  ;;  %991 = vst [vmem:[%s2026_s29 + $0x38] sm:$0xff] %v983_v3 }
 0x174   : > { %v1393_v13 = vpop.eup %1392  ;;  %992 = vst [vmem:[%s2026_s29 + $0x40] sm:$0xff] %v984_v23  ;;  %v978_v28 = vmul.f32 %v1391_v25, %v874_v24 }
 0x175   : > { %v1395_v29 = vpop.eup %1394  ;;  %993 = vst [vmem:[%s2026_s29 + $0x48] sm:$0xff] %v985_v7  ;;  %v979_v30 = vmul.f32 %v1393_v13, %v875_v26 }
 0x176   : > { %v1397_v56 = vpop.eup %1396  ;;  %v980_v57 = vmul.f32 %v1395_v29, %v876_v27  ;;  %986 = vst [vmem:[%s2026_s29 + $0x8] sm:$0xff] %v978_v28 }
 0x177   : > { %v981_v54 = vmul.f32 %v1397_v56, %v877_v53  ;;  %987 = vst [vmem:[%s2026_s29 + $0x10] sm:$0xff] %v979_v30 }
 0x178   : > { %988 = vst [vmem:[%s2026_s29 + $0x18] sm:$0xff] %v980_v57 }
 0x179   : > { %989 = vst [vmem:[%s2026_s29 + $0x20] sm:$0xff] %v981_v54 }
 0x17a   : > { %1556 = shalt.err (!%p1553_p10)
}
 0x17b   : > { %s1557_s29 = scalar_lea.hbm %s2315_s23, 1280  ;;  %s1561_s17 = scalar_lea.hbm %s2408_s7, 5120 }
 0x17c   : > { %p1558_p2 = scmp.ne.s32.totalorder %s2315_s23, %s1557_s29  ;;  %p1562_p7 = scmp.lt.s32.totalorder %s2315_s23, %s2408_s7 }
 0x17d   : > { %p1563_p4 = scmp.lt.s32.totalorder %s1561_s17, %s1557_s29 }
 0x17e   : > { %p1559_p0 = pnand %p1558_p2, %p1793_p3 }
 0x17f   : > { %p1564_p8 = por %p1563_p4, %p1562_p7 }
 0x180   : > { %p1560_p5 = pneg %p1559_p0 }
 0x182   : > { %p1565_p9 = pnand %p1564_p8, %p1560_p5 }
 0x184   : > { %1568 = shalt.err (!%p1565_p9)
}
 0x185   : > { %s1675_s24 = smov 640   ;;  %s1676_s19 = smov 40  }
 0x186   : > { %1266 = dma.vmem_to_hbm [thread:$0]  (%p1793_p3), %s2318_s14, 1280, %s2315_s23, %s995_s4, %s1675_s24, %s1675_s24, %s1676_s19  }
 0x187 PF: > { %s2409_s8 = sld [smem:[#allocation24_spill]] }
 0x188   : > { %s2410_s13 = sld [smem:[#allocation22_spill]] }
 0x18d   : > { %p1302_p1 = scmp.ge.s32.totalorder %s2409_s8, 2 }
 0x18e   : > { %s1026_s11 = sand.u32 1, %s2410_s13  }
 0x18f   : > { %p1292_p11 = pnand %p1302_p1, %p1762_p6  ;;  %s1027_s27 = scalar_lea.sflag [#allocation4], %s1026_s11 }
 0x191   : > { %p1293_p12 = pneg %p1292_p11 }
 0x193   : > { %1626 = dma.done.wait (%p1293_p12), %s1027_s27, 1280  }
 0x194   : > { %1628 = vsyncadd (%p1293_p12), %s1027_s27, 4294966016  ;;  %s31_s29 = sadd.s32 1, %s2409_s8   ;;  %s2412_s1 = sld [smem:[#allocation23_spill]] }
 0x195   : > { %p28_p13 = scmp.ge.s32.totalorder %s31_s29, 6   ;;  %s2413_s26 = sld [smem:[#allocation27_spill]] }
 0x196   : > { %s2414_s18 = sld [smem:[#allocation26_spill]]  ;;  %s2415_s24 = smov %s1635_s25 }
 0x197   : > { %s2417_s27 = smov %s1647_s28 }
 0x198   :  { %30 = sbr.rel (!%p28_p13) target bundleno = 16 (0x10), region = 162 }
 0x19a   : > { %s2416_s25 = smov %s2412_s1 }
 0x19c   : > { %s2418_s28 = smov %s2414_s18 }
 0x19d   :  { %1032 = vsyncpa [#allocation3], 1 }
 0x19e   :  { %1034 = vsyncpa [#allocation3 + $0x1], 1 }
 0x19f   :  { %1035 = vsyncpa [#allocation11], 1 }
 0x1a0   :  { %1037 = vsyncpa [#allocation11 + $0x1], 1 }
 0x1a1   :  { %1038 = vsyncpa [#allocation14], 1 }
 0x1a2   :  { %1040 = vsyncpa [#allocation14 + $0x1], 1 }
 0x1a3   :  { %1041 = vsyncpa [#allocation4], 1 }
 0x1a4   :  { %1043 = vsyncpa [#allocation4 + $0x1], 1 }
 0x1a5   :  { %1044 = vsyncpa [#allocation5], 1 }
 0x1a6   :  { %1046 = vsyncpa [#allocation5 + $0x1], 1 }
 0x1a7   :  { %1047 = vsyncpa [#allocation7], 1 }

</bundles_post_ra>
